<compile_context>
chip_gen: v6e
topology: v6e:2x2x1
jax: 0.10.0
libtpu: 0.0.40
codegen_flags: <defaults>
</compile_context>

<pallas_src>
import functools

import jax
import jax.numpy as jnp
from jax.experimental import pallas as pl
from jax.experimental.pallas import tpu as pltpu

EPS = 1e-3   # matches nn.BatchNorm2d(out_channels, eps=0.001)
LANE = 128


def _round_up(x, m):
    return (x + m - 1) // m * m


def _conv_stats_kernel(x_ref, w_ref, y_ref, stats_ref, *, kh, kw, stride, Ho, Wo):
    # x_ref:     (1, Hp, Wp, Cin_p)        padded NHWC tile (one image, compute dtype)
    # w_ref:     (kh*kw, Cin_p, TCo)       reordered conv weights (compute dtype)
    # y_ref:     (1, Ho*Wo, TCo)  f32      pre-BN conv output
    # stats_ref: (1, 2, TCo)      f32      per-image [sum, sum of squares]
    cin_p = x_ref.shape[-1]
    acc = None
    for i in range(kh):                    # static unroll of the kh*kw window taps
        row_acc = None
        for j in range(kw):
            if stride == 1:
                slab = x_ref[0, i:i + Ho, j:j + Wo, :]
            else:
                # TODO(synk): for stride>1 pre-deinterleave stride phases in the
                # wrapper so these reads stay contiguous (avoids per-tap relayout).
                slab = x_ref[0, i:i + (Ho - 1) * stride + 1:stride,
                                j:j + (Wo - 1) * stride + 1:stride, :]
            # TODO(synk): when Wo % 8 != 0 this flatten forces a relayout per tap;
            # keep the accumulator as (Ho, Wo, TCo) in that case.
            slab = slab.reshape(Ho * Wo, cin_p)
            p = jnp.dot(slab, w_ref[i * kw + j], preferred_element_type=jnp.float32)
            row_acc = p if row_acc is None else row_acc + p
        acc = row_acc if acc is None else acc + row_acc
    y_ref[0] = acc                                       # single f32 writeback
    s = jnp.sum(acc, axis=0, keepdims=True)
    ss = jnp.sum(acc * acc, axis=0, keepdims=True)
    stats_ref[0] = jnp.concatenate([s, ss], axis=0)


def _bn_relu_nchw_kernel(y_ref, scale_ref, shift_ref, o_ref, *, cout):
    # y_ref: (1, TM, Cout_p) f32; scale/shift: (1, Cout_p) f32
    # o_ref: (1, Cout, TM)  -- BN + ReLU + un-pad slice + NHWC->NCHW transpose fused.
    act = jnp.maximum(y_ref[0] * scale_ref[...] + shift_ref[...], 0.0)
    o_ref[0] = jnp.transpose(act)[:cout].astype(o_ref.dtype)


def basic_conv2d(x_nchw, weight, gamma, beta, *, stride=1, padding=1,
                 compute_dtype=jnp.float32):
    """Forward of BasicConv2d. x_nchw: (N, Cin, H, W); weight: (Cout, Cin, kh, kw)."""
    N, Cin, H, W = x_nchw.shape
    Cout, _, kh, kw = weight.shape
    Ho = (H + 2 * padding - kh) // stride + 1
    Wo = (W + 2 * padding - kw) // stride + 1
    HoWo = Ho * Wo
    Hp, Wp = H + 2 * padding, W + 2 * padding

    c_itm = jnp.dtype(compute_dtype).itemsize
    sub = max(8, 32 // c_itm)              # sublane packing multiple for compute dtype
    Cin_p = _round_up(Cin, sub)            # K padded only to sublane multiple, not 128
    Cout_p = _round_up(Cout, LANE)         # lane-dense output channels
    TCo = 256 if Cout_p % 256 == 0 else LANE   # match 256-wide MXU on v6e/v7x when possible
    nCo = Cout_p // TCo

    # TODO(synk): if the surrounding model supplies NHWC activations, drop this
    # transpose and fuse the zero-padding into kernel A (saves two HBM passes).
    x_nhwc = jnp.transpose(x_nchw, (0, 2, 3, 1))
    xp = jnp.pad(x_nhwc, ((0, 0), (padding, padding), (padding, padding),
                          (0, Cin_p - Cin))).astype(compute_dtype)

    # (Cout, Cin, kh, kw) -> (kh*kw, Cin_p, Cout_p), zero padded, compute dtype.
    w = jnp.transpose(weight, (2, 3, 1, 0))
    w = jnp.pad(w, ((0, 0), (0, 0), (0, Cin_p - Cin), (0, Cout_p - Cout)))
    w = w.reshape(kh * kw, Cin_p, Cout_p).astype(compute_dtype)

    # VMEM budgets derived from the actual chip (v5e/v6e: 128 MiB, v7x: 64 MiB).
    try:
        vmem_cap = int(pltpu.get_tpu_info().vmem_capacity_bytes * 0.85)
    except Exception:
        vmem_cap = 52 << 20
    x_blk_b = Hp * Wp * Cin_p * c_itm
    w_blk_b = kh * kw * Cin_p * TCo * c_itm
    y_blk_b = HoWo * TCo * 4
    vmem_a = 2 * (x_blk_b + w_blk_b + y_blk_b + 2 * TCo * 4) + y_blk_b + (4 << 20)
    vmem_a = int(min(max(vmem_a, 16 << 20), vmem_cap))
    # TODO(synk): for very large spatial sizes (e.g. 147x147+ stem layers) add a
    # row-band manual-DMA pipeline so the y block stays bounded on v7x's 64 MiB VMEM.

    kern_a = functools.partial(_conv_stats_kernel, kh=kh, kw=kw, stride=stride,
                               Ho=Ho, Wo=Wo)

    # --- Kernel A: conv (kh*kw shifted-window matmuls) + per-image BN partial sums.
    #     grid = (image, Cout tile); x block is constant across the Cout axis.
    y_flat, stats = pl.pallas_call(
        kern_a,
        out_shape=(jax.ShapeDtypeStruct((N, HoWo, Cout_p), jnp.float32),
                   jax.ShapeDtypeStruct((N, 2, Cout_p), jnp.float32)),
        grid=(N, nCo),
        in_specs=[pl.BlockSpec((1, Hp, Wp, Cin_p), lambda n, co: (n, 0, 0, 0)),
                  pl.BlockSpec((kh * kw, Cin_p, TCo), lambda n, co: (0, 0, co))],
        out_specs=(pl.BlockSpec((1, HoWo, TCo), lambda n, co: (n, 0, co)),
                   pl.BlockSpec((1, 2, TCo), lambda n, co: (n, 0, co))),
        compiler_params=pltpu.CompilerParams(
            dimension_semantics=("parallel", "parallel"),
            vmem_limit_bytes=vmem_a),
        cost_estimate=pl.CostEstimate(
            flops=2 * N * HoWo * kh * kw * Cin_p * Cout_p,
            transcendentals=0,
            bytes_accessed=int(xp.size * c_itm + N * w.size * c_itm
                               + N * (HoWo + 2) * Cout_p * 4)),
    )(xp, w)
    # TODO(synk): if running BN stats are available (eval mode), fold scale/shift+ReLU
    # into kernel A's epilogue and drop kernel B and the y_flat intermediate entirely.
    # TODO(synk): storing y_flat in bf16 would halve the inter-kernel HBM traffic at
    # the cost of output rounding (stats are already taken from the f32 accumulator).

    # --- Tiny cross-image BN reduction (2*Cout_p floats) + affine fold, plain JAX.
    total = jnp.sum(stats, axis=0)                  # (2, Cout_p)
    cnt = jnp.float32(N * HoWo)
    mean = total[0] / cnt
    var = jnp.maximum(total[1] / cnt - mean * mean, 0.0)
    inv = jax.lax.rsqrt(var + EPS)
    gamma_p = jnp.pad(gamma.astype(jnp.float32), (0, Cout_p - Cout))
    beta_p = jnp.pad(beta.astype(jnp.float32), (0, Cout_p - Cout))
    scale = (gamma_p * inv).reshape(1, Cout_p)
    shift = (beta_p - mean * gamma_p * inv).reshape(1, Cout_p)

    # --- Kernel B: BN + ReLU + un-pad + transpose to NCHW, largest lane-dense tile.
    TM = HoWo if HoWo <= 2048 else 2048
    nT = pl.cdiv(HoWo, TM)
    o_itm = x_nchw.dtype.itemsize
    vmem_b = 2 * (TM * Cout_p * 4 + 2 * Cout_p * 4 + Cout * TM * o_itm) \
        + TM * Cout_p * 4 + (2 << 20)
    vmem_b = int(min(max(vmem_b, 16 << 20), vmem_cap))
    out_t = pl.pallas_call(
        functools.partial(_bn_relu_nchw_kernel, cout=Cout),
        out_shape=jax.ShapeDtypeStruct((N, Cout, HoWo), x_nchw.dtype),
        grid=(N, nT),
        in_specs=[pl.BlockSpec((1, TM, Cout_p), lambda n, t: (n, t, 0)),
                  pl.BlockSpec((1, Cout_p), lambda n, t: (0, 0)),
                  pl.BlockSpec((1, Cout_p), lambda n, t: (0, 0))],
        out_specs=pl.BlockSpec((1, Cout, TM), lambda n, t: (n, 0, t)),
        compiler_params=pltpu.CompilerParams(
            dimension_semantics=("parallel", "parallel"),
            vmem_limit_bytes=vmem_b),
        cost_estimate=pl.CostEstimate(
            flops=2 * N * HoWo * Cout_p,
            transcendentals=0,
            bytes_accessed=int(N * HoWo * Cout_p * 4 + N * Cout * HoWo * o_itm)),
    )(y_flat, scale, shift)

    # Contiguous metadata-only reshape; output is already NCHW.
    return out_t.reshape(N, Cout, Ho, Wo)


def reference(x_nchw, weight, gamma, beta, *, stride=1, padding=1):
    """Pure-JAX reference (conv + batch-stat BN + ReLU) for correctness check."""
    y = jax.lax.conv_general_dilated(
        x_nchw, weight, (stride, stride), [(padding, padding)] * 2,
        dimension_numbers=("NCHW", "OIHW", "NCHW"))
    mean = jnp.mean(y, axis=(0, 2, 3), keepdims=True)
    var = jnp.mean(jnp.square(y - mean), axis=(0, 2, 3), keepdims=True)
    y_hat = (y - mean) * jax.lax.rsqrt(var + EPS)
    out = y_hat * gamma.reshape(1, -1, 1, 1) + beta.reshape(1, -1, 1, 1)
    return jnp.maximum(out, 0.0)


if __name__ == "__main__":
    key = jax.random.PRNGKey(0)
    k_x, k_w = jax.random.split(key)

    N, Cin, H, W = 2, 4, 16, 16
    Cout, kh, kw = 8, 3, 3

    x = jax.random.normal(k_x, (N, Cin, H, W), dtype=jnp.float32)
    # Deterministic parameter init (PyTorch BN default: gamma=1, beta=0).
    weight = jax.random.normal(k_w, (Cout, Cin, kh, kw), dtype=jnp.float32) * 0.1
    gamma = jnp.ones((Cout,), dtype=jnp.float32)
    beta = jnp.zeros((Cout,), dtype=jnp.float32)

    out = basic_conv2d(x, weight, gamma, beta, stride=1, padding=1)
    out = jax.block_until_ready(out)

    ref = jax.block_until_ready(reference(x, weight, gamma, beta, stride=1, padding=1))
    assert out.shape == (N, Cout, H, W), out.shape
    max_err = float(jnp.max(jnp.abs(out - ref)))
    assert jnp.allclose(out, ref, atol=1e-4, rtol=1e-4), max_err

    print("KERNEL_OK")
</pallas_src>

<mosaic_0001>
module attributes {stable_mosaic.version = 11 : i64} {
  func.func @_conv_stats_kernel(%arg0: i32, %arg1: i32, %arg2: memref<1x18x18x8xf32, #tpu.memory_space<vmem>>, %arg3: memref<9x8x128xf32, #tpu.memory_space<vmem>>, %arg4: memref<1x256x128xf32, #tpu.memory_space<vmem>>, %arg5: memref<1x2x128xf32, #tpu.memory_space<vmem>>) attributes {dimension_semantics = [#tpu.dimension_semantics<parallel>, #tpu.dimension_semantics<parallel>], iteration_bounds = array<i64: 2, 1>, scalar_prefetch = 0 : i64, scratch_operands = 0 : i64, tpu.core_type = #tpu.core_type<tc>, window_params = [{transform_indices = @transform_0, window_bounds = array<i64: 1, 18, 18, 8>}, {transform_indices = @transform_1, window_bounds = array<i64: 9, 8, 128>}, {transform_indices = @transform_2, window_bounds = array<i64: 1, 256, 128>}, {transform_indices = @transform_3, window_bounds = array<i64: 1, 2, 128>}]} {
    %c0 = arith.constant 0 : index
    %c0_0 = arith.constant 0 : index
    %c0_1 = arith.constant 0 : index
    %c0_2 = arith.constant 0 : index
    %0 = vector.load %arg2[%c0, %c0_0, %c0_1, %c0_2] : memref<1x18x18x8xf32, #tpu.memory_space<vmem>>, vector<1x16x16x8xf32>
    %1 = vector.shape_cast %0 : vector<1x16x16x8xf32> to vector<16x16x8xf32>
    %2 = vector.shape_cast %1 : vector<16x16x8xf32> to vector<256x8xf32>
    %c0_3 = arith.constant 0 : index
    %c0_4 = arith.constant 0 : index
    %c0_5 = arith.constant 0 : index
    %3 = vector.load %arg3[%c0_3, %c0_4, %c0_5] : memref<9x8x128xf32, #tpu.memory_space<vmem>>, vector<1x8x128xf32>
    %4 = vector.shape_cast %3 : vector<1x8x128xf32> to vector<8x128xf32>
    %cst = arith.constant dense<0.000000e+00> : vector<256x128xf32>
    %5 = tpu.matmul %2, %4, %cst {dimension_numbers = #tpu.dot_dimension_numbers<[1], [0], [0], [1], [0, 0, 1, 1], [], []>} : vector<256x8xf32>, vector<8x128xf32>, vector<256x128xf32> -> vector<256x128xf32>
    %c0_6 = arith.constant 0 : index
    %c0_7 = arith.constant 0 : index
    %c1 = arith.constant 1 : index
    %c0_8 = arith.constant 0 : index
    %6 = vector.load %arg2[%c0_6, %c0_7, %c1, %c0_8] : memref<1x18x18x8xf32, #tpu.memory_space<vmem>>, vector<1x16x16x8xf32>
    %7 = vector.shape_cast %6 : vector<1x16x16x8xf32> to vector<16x16x8xf32>
    %8 = vector.shape_cast %7 : vector<16x16x8xf32> to vector<256x8xf32>
    %c1_9 = arith.constant 1 : index
    %c0_10 = arith.constant 0 : index
    %c0_11 = arith.constant 0 : index
    %9 = vector.load %arg3[%c1_9, %c0_10, %c0_11] : memref<9x8x128xf32, #tpu.memory_space<vmem>>, vector<1x8x128xf32>
    %10 = vector.shape_cast %9 : vector<1x8x128xf32> to vector<8x128xf32>
    %cst_12 = arith.constant dense<0.000000e+00> : vector<256x128xf32>
    %11 = tpu.matmul %8, %10, %cst_12 {dimension_numbers = #tpu.dot_dimension_numbers<[1], [0], [0], [1], [0, 0, 1, 1], [], []>} : vector<256x8xf32>, vector<8x128xf32>, vector<256x128xf32> -> vector<256x128xf32>
    %12 = arith.addf %5, %11 : vector<256x128xf32>
    %c0_13 = arith.constant 0 : index
    %c0_14 = arith.constant 0 : index
    %c2 = arith.constant 2 : index
    %c0_15 = arith.constant 0 : index
    %13 = vector.load %arg2[%c0_13, %c0_14, %c2, %c0_15] : memref<1x18x18x8xf32, #tpu.memory_space<vmem>>, vector<1x16x16x8xf32>
    %14 = vector.shape_cast %13 : vector<1x16x16x8xf32> to vector<16x16x8xf32>
    %15 = vector.shape_cast %14 : vector<16x16x8xf32> to vector<256x8xf32>
    %c2_16 = arith.constant 2 : index
    %c0_17 = arith.constant 0 : index
    %c0_18 = arith.constant 0 : index
    %16 = vector.load %arg3[%c2_16, %c0_17, %c0_18] : memref<9x8x128xf32, #tpu.memory_space<vmem>>, vector<1x8x128xf32>
    %17 = vector.shape_cast %16 : vector<1x8x128xf32> to vector<8x128xf32>
    %cst_19 = arith.constant dense<0.000000e+00> : vector<256x128xf32>
    %18 = tpu.matmul %15, %17, %cst_19 {dimension_numbers = #tpu.dot_dimension_numbers<[1], [0], [0], [1], [0, 0, 1, 1], [], []>} : vector<256x8xf32>, vector<8x128xf32>, vector<256x128xf32> -> vector<256x128xf32>
    %19 = arith.addf %12, %18 : vector<256x128xf32>
    %c0_20 = arith.constant 0 : index
    %c1_21 = arith.constant 1 : index
    %c0_22 = arith.constant 0 : index
    %c0_23 = arith.constant 0 : index
    %20 = vector.load %arg2[%c0_20, %c1_21, %c0_22, %c0_23] : memref<1x18x18x8xf32, #tpu.memory_space<vmem>>, vector<1x16x16x8xf32>
    %21 = vector.shape_cast %20 : vector<1x16x16x8xf32> to vector<16x16x8xf32>
    %22 = vector.shape_cast %21 : vector<16x16x8xf32> to vector<256x8xf32>
    %c3 = arith.constant 3 : index
    %c0_24 = arith.constant 0 : index
    %c0_25 = arith.constant 0 : index
    %23 = vector.load %arg3[%c3, %c0_24, %c0_25] : memref<9x8x128xf32, #tpu.memory_space<vmem>>, vector<1x8x128xf32>
    %24 = vector.shape_cast %23 : vector<1x8x128xf32> to vector<8x128xf32>
    %cst_26 = arith.constant dense<0.000000e+00> : vector<256x128xf32>
    %25 = tpu.matmul %22, %24, %cst_26 {dimension_numbers = #tpu.dot_dimension_numbers<[1], [0], [0], [1], [0, 0, 1, 1], [], []>} : vector<256x8xf32>, vector<8x128xf32>, vector<256x128xf32> -> vector<256x128xf32>
    %c0_27 = arith.constant 0 : index
    %c1_28 = arith.constant 1 : index
    %c1_29 = arith.constant 1 : index
    %c0_30 = arith.constant 0 : index
    %26 = vector.load %arg2[%c0_27, %c1_28, %c1_29, %c0_30] : memref<1x18x18x8xf32, #tpu.memory_space<vmem>>, vector<1x16x16x8xf32>
    %27 = vector.shape_cast %26 : vector<1x16x16x8xf32> to vector<16x16x8xf32>
    %28 = vector.shape_cast %27 : vector<16x16x8xf32> to vector<256x8xf32>
    %c4 = arith.constant 4 : index
    %c0_31 = arith.constant 0 : index
    %c0_32 = arith.constant 0 : index
    %29 = vector.load %arg3[%c4, %c0_31, %c0_32] : memref<9x8x128xf32, #tpu.memory_space<vmem>>, vector<1x8x128xf32>
    %30 = vector.shape_cast %29 : vector<1x8x128xf32> to vector<8x128xf32>
    %cst_33 = arith.constant dense<0.000000e+00> : vector<256x128xf32>
    %31 = tpu.matmul %28, %30, %cst_33 {dimension_numbers = #tpu.dot_dimension_numbers<[1], [0], [0], [1], [0, 0, 1, 1], [], []>} : vector<256x8xf32>, vector<8x128xf32>, vector<256x128xf32> -> vector<256x128xf32>
    %32 = arith.addf %25, %31 : vector<256x128xf32>
    %c0_34 = arith.constant 0 : index
    %c1_35 = arith.constant 1 : index
    %c2_36 = arith.constant 2 : index
    %c0_37 = arith.constant 0 : index
    %33 = vector.load %arg2[%c0_34, %c1_35, %c2_36, %c0_37] : memref<1x18x18x8xf32, #tpu.memory_space<vmem>>, vector<1x16x16x8xf32>
    %34 = vector.shape_cast %33 : vector<1x16x16x8xf32> to vector<16x16x8xf32>
    %35 = vector.shape_cast %34 : vector<16x16x8xf32> to vector<256x8xf32>
    %c5 = arith.constant 5 : index
    %c0_38 = arith.constant 0 : index
    %c0_39 = arith.constant 0 : index
    %36 = vector.load %arg3[%c5, %c0_38, %c0_39] : memref<9x8x128xf32, #tpu.memory_space<vmem>>, vector<1x8x128xf32>
    %37 = vector.shape_cast %36 : vector<1x8x128xf32> to vector<8x128xf32>
    %cst_40 = arith.constant dense<0.000000e+00> : vector<256x128xf32>
    %38 = tpu.matmul %35, %37, %cst_40 {dimension_numbers = #tpu.dot_dimension_numbers<[1], [0], [0], [1], [0, 0, 1, 1], [], []>} : vector<256x8xf32>, vector<8x128xf32>, vector<256x128xf32> -> vector<256x128xf32>
    %39 = arith.addf %32, %38 : vector<256x128xf32>
    %40 = arith.addf %19, %39 : vector<256x128xf32>
    %c0_41 = arith.constant 0 : index
    %c2_42 = arith.constant 2 : index
    %c0_43 = arith.constant 0 : index
    %c0_44 = arith.constant 0 : index
    %41 = vector.load %arg2[%c0_41, %c2_42, %c0_43, %c0_44] : memref<1x18x18x8xf32, #tpu.memory_space<vmem>>, vector<1x16x16x8xf32>
    %42 = vector.shape_cast %41 : vector<1x16x16x8xf32> to vector<16x16x8xf32>
    %43 = vector.shape_cast %42 : vector<16x16x8xf32> to vector<256x8xf32>
    %c6 = arith.constant 6 : index
    %c0_45 = arith.constant 0 : index
    %c0_46 = arith.constant 0 : index
    %44 = vector.load %arg3[%c6, %c0_45, %c0_46] : memref<9x8x128xf32, #tpu.memory_space<vmem>>, vector<1x8x128xf32>
    %45 = vector.shape_cast %44 : vector<1x8x128xf32> to vector<8x128xf32>
    %cst_47 = arith.constant dense<0.000000e+00> : vector<256x128xf32>
    %46 = tpu.matmul %43, %45, %cst_47 {dimension_numbers = #tpu.dot_dimension_numbers<[1], [0], [0], [1], [0, 0, 1, 1], [], []>} : vector<256x8xf32>, vector<8x128xf32>, vector<256x128xf32> -> vector<256x128xf32>
    %c0_48 = arith.constant 0 : index
    %c2_49 = arith.constant 2 : index
    %c1_50 = arith.constant 1 : index
    %c0_51 = arith.constant 0 : index
    %47 = vector.load %arg2[%c0_48, %c2_49, %c1_50, %c0_51] : memref<1x18x18x8xf32, #tpu.memory_space<vmem>>, vector<1x16x16x8xf32>
    %48 = vector.shape_cast %47 : vector<1x16x16x8xf32> to vector<16x16x8xf32>
    %49 = vector.shape_cast %48 : vector<16x16x8xf32> to vector<256x8xf32>
    %c7 = arith.constant 7 : index
    %c0_52 = arith.constant 0 : index
    %c0_53 = arith.constant 0 : index
    %50 = vector.load %arg3[%c7, %c0_52, %c0_53] : memref<9x8x128xf32, #tpu.memory_space<vmem>>, vector<1x8x128xf32>
    %51 = vector.shape_cast %50 : vector<1x8x128xf32> to vector<8x128xf32>
    %cst_54 = arith.constant dense<0.000000e+00> : vector<256x128xf32>
    %52 = tpu.matmul %49, %51, %cst_54 {dimension_numbers = #tpu.dot_dimension_numbers<[1], [0], [0], [1], [0, 0, 1, 1], [], []>} : vector<256x8xf32>, vector<8x128xf32>, vector<256x128xf32> -> vector<256x128xf32>
    %53 = arith.addf %46, %52 : vector<256x128xf32>
    %c0_55 = arith.constant 0 : index
    %c2_56 = arith.constant 2 : index
    %c2_57 = arith.constant 2 : index
    %c0_58 = arith.constant 0 : index
    %54 = vector.load %arg2[%c0_55, %c2_56, %c2_57, %c0_58] : memref<1x18x18x8xf32, #tpu.memory_space<vmem>>, vector<1x16x16x8xf32>
    %55 = vector.shape_cast %54 : vector<1x16x16x8xf32> to vector<16x16x8xf32>
    %56 = vector.shape_cast %55 : vector<16x16x8xf32> to vector<256x8xf32>
    %c8 = arith.constant 8 : index
    %c0_59 = arith.constant 0 : index
    %c0_60 = arith.constant 0 : index
    %57 = vector.load %arg3[%c8, %c0_59, %c0_60] : memref<9x8x128xf32, #tpu.memory_space<vmem>>, vector<1x8x128xf32>
    %58 = vector.shape_cast %57 : vector<1x8x128xf32> to vector<8x128xf32>
    %cst_61 = arith.constant dense<0.000000e+00> : vector<256x128xf32>
    %59 = tpu.matmul %56, %58, %cst_61 {dimension_numbers = #tpu.dot_dimension_numbers<[1], [0], [0], [1], [0, 0, 1, 1], [], []>} : vector<256x8xf32>, vector<8x128xf32>, vector<256x128xf32> -> vector<256x128xf32>
    %60 = arith.addf %53, %59 : vector<256x128xf32>
    %61 = arith.addf %40, %60 : vector<256x128xf32>
    %c0_62 = arith.constant 0 : index
    %c0_63 = arith.constant 0 : index
    %c0_64 = arith.constant 0 : index
    %62 = vector.load %arg4[%c0_62, %c0_63, %c0_64] : memref<1x256x128xf32, #tpu.memory_space<vmem>>, vector<1x256x128xf32>
    %63 = vector.shape_cast %62 : vector<1x256x128xf32> to vector<256x128xf32>
    %64 = vector.shape_cast %61 : vector<256x128xf32> to vector<1x256x128xf32>
    tpu.vector_store %arg4[%c0_62, %c0_63, %c0_64], %64 {strides = array<i32>} : memref<1x256x128xf32, #tpu.memory_space<vmem>>, vector<1x256x128xf32>,
    %cst_65 = arith.constant dense<0.000000e+00> : vector<128xf32>
    %65 = vector.multi_reduction <add>, %61, %cst_65 [0] : vector<256x128xf32> to vector<128xf32>
    %66 = vector.shape_cast %65 : vector<128xf32> to vector<1x128xf32>
    %67 = arith.mulf %61, %61 : vector<256x128xf32>
    %cst_66 = arith.constant dense<0.000000e+00> : vector<128xf32>
    %68 = vector.multi_reduction <add>, %67, %cst_66 [0] : vector<256x128xf32> to vector<128xf32>
    %69 = vector.shape_cast %68 : vector<128xf32> to vector<1x128xf32>
    %70 = tpu.concatenate %66, %69 in 0 : vector<1x128xf32>, vector<1x128xf32> -> vector<2x128xf32>
    %c0_67 = arith.constant 0 : index
    %c0_68 = arith.constant 0 : index
    %c0_69 = arith.constant 0 : index
    %71 = vector.load %arg5[%c0_67, %c0_68, %c0_69] : memref<1x2x128xf32, #tpu.memory_space<vmem>>, vector<1x2x128xf32>
    %72 = vector.shape_cast %71 : vector<1x2x128xf32> to vector<2x128xf32>
    %73 = vector.shape_cast %70 : vector<2x128xf32> to vector<1x2x128xf32>
    tpu.vector_store %arg5[%c0_67, %c0_68, %c0_69], %73 {strides = array<i32>} : memref<1x2x128xf32, #tpu.memory_space<vmem>>, vector<1x2x128xf32>,
    return
  }
  func.func @transform_0(%arg0: i32, %arg1: i32) -> (i32, i32, i32, i32) {
    %c0_i32 = arith.constant 0 : i32
    %c0_i32_0 = arith.constant 0 : i32
    %c0_i32_1 = arith.constant 0 : i32
    %c0_i32_2 = arith.constant 0 : i32
    return %arg0, %c0_i32, %c0_i32_0, %c0_i32_1 : i32, i32, i32, i32
  }
  func.func @transform_1(%arg0: i32, %arg1: i32) -> (i32, i32, i32) {
    %c0_i32 = arith.constant 0 : i32
    %c0_i32_0 = arith.constant 0 : i32
    %c0_i32_1 = arith.constant 0 : i32
    return %c0_i32, %c0_i32_0, %arg1 : i32, i32, i32
  }
  func.func @transform_2(%arg0: i32, %arg1: i32) -> (i32, i32, i32) {
    %c0_i32 = arith.constant 0 : i32
    %c0_i32_0 = arith.constant 0 : i32
    return %arg0, %c0_i32, %arg1 : i32, i32, i32
  }
  func.func @transform_3(%arg0: i32, %arg1: i32) -> (i32, i32, i32) {
    %c0_i32 = arith.constant 0 : i32
    %c0_i32_0 = arith.constant 0 : i32
    return %arg0, %c0_i32, %arg1 : i32, i32, i32
  }
}

</mosaic_0001>

<bundles_post_ra>
// kernel: tpu_custom_call.1
= control target key start
LH: loop header
LB: loop body
LE: loop exit
PB: predicated region body
PF: predicated region fallthrough
CT: control target
= control target key end

     0   :  { %9 = vsyncpa [#allocation3], 0  ;;  %s6887_s0 = inlined_call_operand.vmem [shape: f32[2,18,18,8], index: 0, kind: input, shape index: {}]   ;;  %s6888_s1 = inlined_call_operand.vmem [shape: f32[9,8,128], index: 1, kind: input, shape index: {}]   ;;  %s6889_s2 = inlined_call_operand.hbm [shape: f32[2,256,128], index: 2, kind: output, shape index: {0}]   ;;  %s6890_s3 = inlined_call_operand.hbm [shape: f32[2,2,128], index: 3, kind: output, shape index: {1}]  }
   0x1   :  { %11 = vsyncpa [#allocation3 + $0x1], 0 }
   0x2   :  { %12 = vsyncpa [#allocation5], 0 }
   0x3   :  { %14 = vsyncpa [#allocation5 + $0x1], 0  ;;  %s5314_s12 = smov 0   ;;  %s5316_s13 = smov 0  }
   0x4   :  { %s5318_s14 = smov 0   ;;  %s5320_s15 = smov 0  }
   0x5   :  { %s5322_s16 = smov 0   ;;  %s5324_s17 = smov 0  }
   0x6 LB: > { %s3865_s18 = sadd.s32 4294967295, %s5288_s17   ;;  %s3866_s19 = sadd.s32 4294967294, %s5288_s17   ;;  %s5288_s17 = sphi %s5324_s17, %s20_s17   ;;  %s5284_s16 = sphi %s5322_s16, %s7138_s16   ;;  %s5280_s15 = sphi %s5320_s15, %s7137_s15   ;;  %s5276_s14 = sphi %s5318_s14, %s7136_s14   ;;  %s5272_s13 = sphi %s5316_s13, %s7135_s13   ;;  %s5268_s12 = sphi %s5314_s12, %s7134_s12  }
   0x7   : > { %s32_s20 = sadd.s32 1, %s5284_s16  ;;  %s93_s21 = sadd.s32 1, %s5276_s14 }
   0x8   : > { %p34_p0 = scmp.ge.s32.totalorder %s32_s20, 2  ;;  %p103_p1 = scmp.ne.s32.totalorder %s5276_s14, %s5272_s13 }
   0x9   : > { %p104_p2 = scmp.eq.s32.totalorder %s3865_s18, 1  ;;  %p109_p3 = scmp.ne.s32.totalorder %s5272_s13, %s5268_s12 }
   0xa   : > { %s7140_s20 = smov (%p34_p0, %s32_s20), 0  ;;  %p110_p5 = scmp.eq.s32.totalorder %s3866_s19, 1 }
   0xb   : > { %p5354_p4 = por %p104_p2, %p103_p1  ;;  %s88_s23 = ssub.s32 %s5284_s16, %s7140_s20 }
   0xc   : > { %p3870_p6 = scmp.ge.s32.totalorder %s5288_s17, 1  ;;  %p91_p7 = scmp.eq.s32.totalorder %s88_s23, 0 }
   0xd   : > { %p5361_p8 = por %p110_p5, %p109_p3  ;;  %p171_p9 = scmp.lt.s32.totalorder %s5288_s17, 3 }
   0xe   : > { %s5367_s25 = scalar_select %p91_p7, %s5276_s14, %s93_s21  }
   0xf   : > { %p172_p10 = pnand %p3870_p6, %p171_p9 }
  0x11   : > { %175 = sbr.rel (%p172_p10) target bundleno = 560 (0x230), region = 28 }
  0x16   : > { %v3874_v0 = vld [vmem:[%s6888_s1 + $0x8] sm:$0xff]  ;;  %p204_p11 = scmp.lt.s32.totalorder %s5280_s15, 1  ;;  %v245_v1 = vld [vmem:[%s6888_s1] sm:$0xff]  ;;  %v3939_v2 = vld [vmem:[%s6888_s1 + $0x10] sm:$0xff]  ;;  %vm280_vm0 = vcmask 64512   ;;  %s4369_s8 = sshll.u32 %s5280_s15, 12 }
  0x17   : > { %5117 = vmatprep.subr.mxu1 %v3874_v0  ;;  %4667 = vmatprep.subr.mxu0 %v3874_v0  ;;  %v5408_v9 = vld [vmem:[%s6888_s1 + $0x20] sm:$0xff]  ;;  %v5413_v10 = vld [vmem:[%s6888_s1 + $0x18] sm:$0xff]  ;;  %v5568_v43 = vld [vmem:[%s6888_s1 + $0x28] sm:$0xff]  ;;  %s6811_s18 = scalar_lea.hbm %s6889_s2, %s4369_s8  ;;  %s5290_s23 = smov [#allocation2]  }
  0x18   : > { %5118 = vmatpush3.msra.mxu1 %v3874_v0  ;;  %4668 = vmatpush3.msra.mxu0 %v3874_v0  ;;  %s205_s5 = scalar_select %p204_p11, %s5280_s15, 1  ;;  %v5573_v44 = vld [vmem:[%s6888_s1 + $0x38] sm:$0xff] }
  0x19   : > { %4717 = vmatprep.subr.mxu1 %v245_v1  ;;  %4767 = vmatprep.subr.mxu0 %v3939_v2  ;;  %s5186_s26 = sshll.u32 %s5290_s23, 4  ;;  %s5187_s26 = int_to_ptr.vmem [resolvable:$false] %s5186_s26 }
  0x1a   : > { %s5119_s6 = smul.u32 432, %s205_s5  ;;  %s6701_s5 = sand.u32 1, %s5272_s13  }
  0x1b   : > { %s3712_s19 = scalar_lea.sflag [#allocation3], %s6701_s5  ;;  %s5188_s27 = scalar_lea.vmem %s5187_s26, 8192 }
  0x1c   : > { %s5383_s9 = scalar_lea.vmem %s6887_s0, %s5119_s6  ;;  %s3871_s6 = sshll.u32 %s6701_s5, 8 }
  0x1d   : > { %v246_v3 = vld [vmem:[%s5383_s9 + $0x1] sm:$0xff]  ;;  %v247_v5 = vld [vmem:[%s5383_s9 + $0x9] sm:$0xff]  ;;  %v5397_v7 = vld [vmem:[%s5383_s9 + $0x19] sm:$0xff]  ;;  %s6715_s7 = scalar_lea.vmem [#allocation2], %s3871_s6 }
  0x1e   : > { %v5387_v4 = vld [vmem:[%s5383_s9 + $0xc1] sm:$0xff]  ;;  %4669 = vmatprep.mubr.msk.f32.mxu0 %vm280_vm0, %v246_v3  ;;  %v5394_v6 = vld [vmem:[%s5383_s9 + $0xc9] sm:$0xff]  ;;  %v5400_v8 = vld [vmem:[%s5383_s9 + $0xd9] sm:$0xff] }
  0x1f   : > { %4693 = vmatprep.mubr.msk.f32.mxu1 %vm280_vm0, %v5387_v4  ;;  %4670 = vmatmul.mubr.msk.f32.vlgmr.msra.gmra.mxu0 %vm280_vm0, %v247_v5  ;;  %v5416_v11 = vld [vmem:[%s5383_s9 + $0x21] sm:$0xff]  ;;  %v5426_v13 = vld [vmem:[%s5383_s9 + $0x31] sm:$0xff]  ;;  %v5442_v15 = vld [vmem:[%s5383_s9 + $0x39] sm:$0xff] }
  0x20   : > { %4694 = vmatmul.mubr.msk.f32.vlgmr.msra.gmra.mxu1 %vm280_vm0, %v5394_v6  ;;  %4768 = vmatpush3.msra.mxu0 %v3939_v2  ;;  %v5419_v12 = vld [vmem:[%s5383_s9 + $0xe1] sm:$0xff]  ;;  %v5429_v14 = vld [vmem:[%s5383_s9 + $0xf1] sm:$0xff]  ;;  %v5445_v16 = vld [vmem:[%s5383_s9 + $0xf9] sm:$0xff] }
  0x21   : > { %4718 = vmatpush3.msra.mxu1 %v245_v1  ;;  %4672 = vmatprep.mubr.msk.f32.mxu0 %vm280_vm0, %v5397_v7  ;;  %v5448_v17 = vld [vmem:[%s5383_s9 + $0x49] sm:$0xff]  ;;  %v5462_v19 = vld [vmem:[%s5383_s9 + $0x51] sm:$0xff]  ;;  %v5468_v21 = vld [vmem:[%s5383_s9 + $0x61] sm:$0xff] }
  0x22   : > { %4696 = vmatprep.mubr.msk.f32.mxu1 %vm280_vm0, %v5400_v8  ;;  %4817 = vmatprep.subr.mxu1 %v5408_v9  ;;  %v5451_v18 = vld [vmem:[%s5383_s9 + $0x109] sm:$0xff]  ;;  %v5465_v20 = vld [vmem:[%s5383_s9 + $0x111] sm:$0xff]  ;;  %v5471_v22 = vld [vmem:[%s5383_s9 + $0x121] sm:$0xff] }
  0x23   : > { %4867 = vmatprep.subr.mxu0 %v5413_v10  ;;  %4673 = vmatmul.mubr.msk.f32.gmra.mxu0 %vm280_vm0, %v5416_v11  ;;  %v5482_v23 = vld [vmem:[%s5383_s9 + $0x69] sm:$0xff]  ;;  %v5488_v25 = vld [vmem:[%s5383_s9 + $0x79] sm:$0xff]  ;;  %v5502_v27 = vld [vmem:[%s5383_s9 + $0x81] sm:$0xff] }
  0x24   : > { %4697 = vmatmul.mubr.msk.f32.gmra.mxu1 %vm280_vm0, %v5419_v12  ;;  %4675 = vmatprep.mubr.msk.f32.mxu0 %vm280_vm0, %v5426_v13  ;;  %v5485_v24 = vld [vmem:[%s5383_s9 + $0x129] sm:$0xff]  ;;  %v5491_v26 = vld [vmem:[%s5383_s9 + $0x139] sm:$0xff]  ;;  %v5505_v28 = vld [vmem:[%s5383_s9 + $0x141] sm:$0xff] }
  0x25   : > { %4699 = vmatprep.mubr.msk.f32.mxu1 %vm280_vm0, %v5429_v14  ;;  %v5508_v29 = vld [vmem:[%s5383_s9 + $0x91] sm:$0xff]  ;;  %v5522_v31 = vld [vmem:[%s5383_s9 + $0x99] sm:$0xff]  ;;  %v5528_v33 = vld [vmem:[%s5383_s9 + $0xa9] sm:$0xff] }
  0x26   : > { %v5511_v30 = vld [vmem:[%s5383_s9 + $0x151] sm:$0xff]  ;;  %v5525_v32 = vld [vmem:[%s5383_s9 + $0x159] sm:$0xff]  ;;  %v5531_v34 = vld [vmem:[%s5383_s9 + $0x169] sm:$0xff] }
  0x27   : > { %4676 = vmatmul.mubr.msk.f32.gmra.mxu0 %vm280_vm0, %v5442_v15  ;;  %v5542_v35 = vld [vmem:[%s5383_s9 + $0xb1] sm:$0xff]  ;;  %v213_v37 = vld [vmem:[%s5383_s9] sm:$0xff]  ;;  %v214_v39 = vld [vmem:[%s5383_s9 + $0x8] sm:$0xff] }
  0x28   : > { %4700 = vmatmul.mubr.msk.f32.gmra.mxu1 %vm280_vm0, %v5445_v16  ;;  %4678 = vmatprep.mubr.msk.f32.mxu0 %vm280_vm0, %v5448_v17  ;;  %v5545_v36 = vld [vmem:[%s5383_s9 + $0x171] sm:$0xff]  ;;  %v923_v38 = vld [vmem:[%s5383_s9 + $0x2] sm:$0xff]  ;;  %v5561_v42 = vld [vmem:[%s5383_s9 + $0x1a] sm:$0xff] }
  0x29   : > { %4702 = vmatprep.mubr.msk.f32.mxu1 %vm280_vm0, %v5451_v18  ;;  %6960 = vst [vmem:[#allocation8_spill] sm:$0xff] %v5545_v36  ;;  %v924_v40 = vld [vmem:[%s5383_s9 + $0xa] sm:$0xff]  ;;  %v5558_v41 = vld [vmem:[%s5383_s9 + $0x18] sm:$0xff]  ;;  %6961 = vst [vmem:[#allocation9_spill] sm:$0xff] %v5561_v42 }
  0x2a   : > { %v5578_v45 = vld [vmem:[%s5383_s9 + $0x20] sm:$0xff]  ;;  %v5588_v47 = vld [vmem:[%s5383_s9 + $0x30] sm:$0xff]  ;;  %v5604_v49 = vld [vmem:[%s5383_s9 + $0x38] sm:$0xff] }
  0x2b   : > { %4679 = vmatmul.mubr.msk.f32.gmra.mxu0 %vm280_vm0, %v5462_v19  ;;  %v5581_v46 = vld [vmem:[%s5383_s9 + $0x22] sm:$0xff]  ;;  %v5591_v48 = vld [vmem:[%s5383_s9 + $0x32] sm:$0xff]  ;;  %v5607_v50 = vld [vmem:[%s5383_s9 + $0x3a] sm:$0xff] }
  0x2c   : > { %4703 = vmatmul.mubr.msk.f32.gmra.mxu1 %vm280_vm0, %v5465_v20  ;;  %4681 = vmatprep.mubr.msk.f32.mxu0 %vm280_vm0, %v5468_v21  ;;  %6962 = vst [vmem:[#allocation10_spill] sm:$0xff] %v5581_v46  ;;  %6963 = vst [vmem:[#allocation11_spill] sm:$0xff] %v5591_v48  ;;  %v5610_v51 = vld [vmem:[%s5383_s9 + $0x48] sm:$0xff]  ;;  %v5624_v53 = vld [vmem:[%s5383_s9 + $0x50] sm:$0xff] }
  0x2d   : > { %4705 = vmatprep.mubr.msk.f32.mxu1 %vm280_vm0, %v5471_v22  ;;  %6964 = vst [vmem:[#allocation12_spill] sm:$0xff] %v5607_v50  ;;  %v5613_v52 = vld [vmem:[%s5383_s9 + $0x4a] sm:$0xff]  ;;  %v5627_v54 = vld [vmem:[%s5383_s9 + $0x52] sm:$0xff]  ;;  %v5630_v55 = vld [vmem:[%s5383_s9 + $0x60] sm:$0xff] }
  0x2e   : > { %6965 = vst [vmem:[#allocation13_spill] sm:$0xff] %v5613_v52  ;;  %6966 = vst [vmem:[#allocation14_spill] sm:$0xff] %v5627_v54  ;;  %v5633_v56 = vld [vmem:[%s5383_s9 + $0x62] sm:$0xff]  ;;  %v5647_v58 = vld [vmem:[%s5383_s9 + $0x6a] sm:$0xff] }
  0x2f   : > { %4682 = vmatmul.mubr.msk.f32.gmra.mxu0 %vm280_vm0, %v5482_v23  ;;  %6967 = vst [vmem:[#allocation15_spill] sm:$0xff] %v5633_v56  ;;  %v5644_v57 = vld [vmem:[%s5383_s9 + $0x68] sm:$0xff]  ;;  %6968 = vst [vmem:[#allocation16_spill] sm:$0xff] %v5647_v58  ;;  %v5650_v59 = vld [vmem:[%s5383_s9 + $0x78] sm:$0xff] }
  0x30   : > { %4706 = vmatmul.mubr.msk.f32.gmra.mxu1 %vm280_vm0, %v5485_v24  ;;  %4684 = vmatprep.mubr.msk.f32.mxu0 %vm280_vm0, %v5488_v25  ;;  %v5653_v60 = vld [vmem:[%s5383_s9 + $0x7a] sm:$0xff]  ;;  %v5667_v62 = vld [vmem:[%s5383_s9 + $0x82] sm:$0xff]  ;;  %v5670_v63 = vld [vmem:[%s5383_s9 + $0x90] sm:$0xff] }
  0x31   : > { %4708 = vmatprep.mubr.msk.f32.mxu1 %vm280_vm0, %v5491_v26  ;;  %6969 = vst [vmem:[#allocation17_spill] sm:$0xff] %v5653_v60  ;;  %v5664_v61 = vld [vmem:[%s5383_s9 + $0x80] sm:$0xff]  ;;  %6970 = vst [vmem:[#allocation18_spill] sm:$0xff] %v5667_v62  ;;  %v5673_v0 = vld [vmem:[%s5383_s9 + $0x92] sm:$0xff] }
  0x32   : > { %6971 = vst [vmem:[#allocation19_spill] sm:$0xff] %v5673_v0  ;;  %v5684_v1 = vld [vmem:[%s5383_s9 + $0x98] sm:$0xff]  ;;  %v5690_v3 = vld [vmem:[%s5383_s9 + $0xa8] sm:$0xff] }
  0x33   : > { %4685 = vmatmul.mubr.msk.f32.gmra.mxu0 %vm280_vm0, %v5502_v27  ;;  %v5687_v2 = vld [vmem:[%s5383_s9 + $0x9a] sm:$0xff]  ;;  %v5693_v5 = vld [vmem:[%s5383_s9 + $0xaa] sm:$0xff] }
  0x34   : > { %4709 = vmatmul.mubr.msk.f32.gmra.mxu1 %vm280_vm0, %v5505_v28  ;;  %4687 = vmatprep.mubr.msk.f32.mxu0 %vm280_vm0, %v5508_v29  ;;  %6972 = vst [vmem:[#allocation20_spill] sm:$0xff] %v5687_v2  ;;  %6973 = vst [vmem:[#allocation21_spill] sm:$0xff] %v5693_v5 }
  0x35   : > { %4711 = vmatprep.mubr.msk.f32.mxu1 %vm280_vm0, %v5511_v30 }
  0x37   : > { %4688 = vmatmul.mubr.msk.f32.gmra.mxu0 %vm280_vm0, %v5522_v31 }
  0x38   : > { %4712 = vmatmul.mubr.msk.f32.gmra.mxu1 %vm280_vm0, %v5525_v32  ;;  %4690 = vmatprep.mubr.msk.f32.mxu0 %vm280_vm0, %v5528_v33 }
  0x39   : > { %4714 = vmatprep.mubr.msk.f32.mxu1 %vm280_vm0, %v5531_v34 }
  0x3b   : > { %4691 = vmatmul.mubr.msk.f32.gmra.mxu0 %vm280_vm0, %v5542_v35 }
  0x3c   : > { %4715 = vmatmul.mubr.msk.f32.gmra.mxu1 %vm280_vm0, %v5545_v36  ;;  %4769 = vmatprep.mubr.msk.f32.mxu0 %vm280_vm0, %v923_v38  ;;  %v5713_v38 = vld [vmem:[%s5383_s9 + $0xc2] sm:$0xff]  ;;  %v5853_v36 = vld [vmem:[%s5383_s9 + $0x16a] sm:$0xff] }
  0x3d   : > { %4719 = vmatprep.mubr.msk.f32.mxu1 %vm280_vm0, %v213_v37  ;;  %v5710_v37 = vld [vmem:[%s5383_s9 + $0xc0] sm:$0xff]  ;;  %6975 = vst [vmem:[#allocation23_spill] sm:$0xff] %v5713_v38  ;;  %6995 = vst [vmem:[#allocation43_spill] sm:$0xff] %v5853_v36 }
  0x3f   : > { %4770 = vmatmul.mubr.msk.f32.vlgmr.msra.gmra.mxu0 %vm280_vm0, %v924_v40  ;;  %v5727_v40 = vld [vmem:[%s5383_s9 + $0xca] sm:$0xff] }
  0x40   : > { %4720 = vmatmul.mubr.msk.f32.vlgmr.msra.gmra.mxu1 %vm280_vm0, %v214_v39  ;;  %4868 = vmatpush3.msra.mxu0 %v5413_v10  ;;  %v5707_v10 = vld [vmem:[%s5383_s9 + $0xb2] sm:$0xff]  ;;  %v5724_v39 = vld [vmem:[%s5383_s9 + $0xc8] sm:$0xff]  ;;  %6976 = vst [vmem:[#allocation24_spill] sm:$0xff] %v5727_v40 }
  0x41   : > { %4818 = vmatpush3.msra.mxu1 %v5408_v9  ;;  %4722 = vmatprep.mubr.msk.f32.mxu1 %vm280_vm0, %v5558_v41  ;;  %v5704_v9 = vld [vmem:[%s5383_s9 + $0xb0] sm:$0xff]  ;;  %6974 = vst [vmem:[#allocation22_spill] sm:$0xff] %v5707_v10 }
  0x42   : > { %4772 = vmatprep.mubr.msk.f32.mxu0 %vm280_vm0, %v5561_v42  ;;  %4917 = vmatprep.subr.mxu1 %v5568_v43  ;;  %v5850_v42 = vld [vmem:[%s5383_s9 + $0x168] sm:$0xff] }
  0x43   : > { %4967 = vmatprep.subr.mxu0 %v5573_v44  ;;  %4773 = vmatmul.mubr.msk.f32.gmra.mxu0 %vm280_vm0, %v5581_v46  ;;  %v5833_v46 = vld [vmem:[%s5383_s9 + $0x152] sm:$0xff] }
  0x44   : > { %4723 = vmatmul.mubr.msk.f32.gmra.mxu1 %vm280_vm0, %v5578_v45  ;;  %4775 = vmatprep.mubr.msk.f32.mxu0 %vm280_vm0, %v5591_v48  ;;  %v5830_v48 = vld [vmem:[%s5383_s9 + $0x150] sm:$0xff]  ;;  %6992 = vst [vmem:[#allocation40_spill] sm:$0xff] %v5833_v46 }
  0x45   : > { %4725 = vmatprep.mubr.msk.f32.mxu1 %vm280_vm0, %v5588_v47  ;;  %6991 = vst [vmem:[#allocation39_spill] sm:$0xff] %v5830_v48 }
  0x47   : > { %4776 = vmatmul.mubr.msk.f32.gmra.mxu0 %vm280_vm0, %v5607_v50  ;;  %v5813_v50 = vld [vmem:[%s5383_s9 + $0x13a] sm:$0xff] }
  0x48   : > { %4726 = vmatmul.mubr.msk.f32.gmra.mxu1 %vm280_vm0, %v5604_v49  ;;  %4778 = vmatprep.mubr.msk.f32.mxu0 %vm280_vm0, %v5613_v52  ;;  %v5810_v52 = vld [vmem:[%s5383_s9 + $0x138] sm:$0xff]  ;;  %6988 = vst [vmem:[#allocation36_spill] sm:$0xff] %v5813_v50 }
  0x49   : > { %4728 = vmatprep.mubr.msk.f32.mxu1 %vm280_vm0, %v5610_v51  ;;  %6987 = vst [vmem:[#allocation35_spill] sm:$0xff] %v5810_v52 }
  0x4b   : > { %4779 = vmatmul.mubr.msk.f32.gmra.mxu0 %vm280_vm0, %v5627_v54  ;;  %v5793_v54 = vld [vmem:[%s5383_s9 + $0x122] sm:$0xff] }
  0x4c   : > { %4729 = vmatmul.mubr.msk.f32.gmra.mxu1 %vm280_vm0, %v5624_v53  ;;  %4781 = vmatprep.mubr.msk.f32.mxu0 %vm280_vm0, %v5633_v56  ;;  %v5790_v56 = vld [vmem:[%s5383_s9 + $0x120] sm:$0xff]  ;;  %6984 = vst [vmem:[#allocation32_spill] sm:$0xff] %v5793_v54 }
  0x4d   : > { %4731 = vmatprep.mubr.msk.f32.mxu1 %vm280_vm0, %v5630_v55  ;;  %6983 = vst [vmem:[#allocation31_spill] sm:$0xff] %v5790_v56 }
  0x4f   : > { %4782 = vmatmul.mubr.msk.f32.gmra.mxu0 %vm280_vm0, %v5647_v58  ;;  %v5773_v58 = vld [vmem:[%s5383_s9 + $0x10a] sm:$0xff] }
  0x50   : > { %4732 = vmatmul.mubr.msk.f32.gmra.mxu1 %vm280_vm0, %v5644_v57  ;;  %4784 = vmatprep.mubr.msk.f32.mxu0 %vm280_vm0, %v5653_v60  ;;  %v5770_v60 = vld [vmem:[%s5383_s9 + $0x108] sm:$0xff]  ;;  %6981 = vst [vmem:[#allocation29_spill] sm:$0xff] %v5773_v58 }
  0x51   : > { %4734 = vmatprep.mubr.msk.f32.mxu1 %vm280_vm0, %v5650_v59 }
  0x53   : > { %4785 = vmatmul.mubr.msk.f32.gmra.mxu0 %vm280_vm0, %v5667_v62  ;;  %v5753_v62 = vld [vmem:[%s5383_s9 + $0xf2] sm:$0xff] }
  0x54   : > { %4735 = vmatmul.mubr.msk.f32.gmra.mxu1 %vm280_vm0, %v5664_v61  ;;  %4787 = vmatprep.mubr.msk.f32.mxu0 %vm280_vm0, %v5673_v0  ;;  %v5750_v0 = vld [vmem:[%s5383_s9 + $0xf0] sm:$0xff]  ;;  %6979 = vst [vmem:[#allocation27_spill] sm:$0xff] %v5753_v62 }
  0x55   : > { %4737 = vmatprep.mubr.msk.f32.mxu1 %vm280_vm0, %v5670_v63 }
  0x57   : > { %4788 = vmatmul.mubr.msk.f32.gmra.mxu0 %vm280_vm0, %v5687_v2  ;;  %v5733_v2 = vld [vmem:[%s5383_s9 + $0xda] sm:$0xff] }
  0x58   : > { %4738 = vmatmul.mubr.msk.f32.gmra.mxu1 %vm280_vm0, %v5684_v1  ;;  %4790 = vmatprep.mubr.msk.f32.mxu0 %vm280_vm0, %v5693_v5  ;;  %v5730_v5 = vld [vmem:[%s5383_s9 + $0xd8] sm:$0xff]  ;;  %6977 = vst [vmem:[#allocation25_spill] sm:$0xff] %v5733_v2 }
  0x59   : > { %4740 = vmatprep.mubr.msk.f32.mxu1 %vm280_vm0, %v5690_v3 }
  0x5b   : > { %4791 = vmatmul.mubr.msk.f32.gmra.mxu0 %vm280_vm0, %v5707_v10  ;;  %v5747_v10 = vld [vmem:[%s5383_s9 + $0xe2] sm:$0xff] }
  0x5c   : > { %4741 = vmatmul.mubr.msk.f32.gmra.mxu1 %vm280_vm0, %v5704_v9  ;;  %4793 = vmatprep.mubr.msk.f32.mxu0 %vm280_vm0, %v5713_v38  ;;  %v5744_v38 = vld [vmem:[%s5383_s9 + $0xe0] sm:$0xff]  ;;  %6978 = vst [vmem:[#allocation26_spill] sm:$0xff] %v5747_v10 }
  0x5d   : > { %4743 = vmatprep.mubr.msk.f32.mxu1 %vm280_vm0, %v5710_v37 }
  0x5f   : > { %4794 = vmatmul.mubr.msk.f32.gmra.mxu0 %vm280_vm0, %v5727_v40  ;;  %v5767_v40 = vld [vmem:[%s5383_s9 + $0xfa] sm:$0xff] }
  0x60   : > { %4744 = vmatmul.mubr.msk.f32.gmra.mxu1 %vm280_vm0, %v5724_v39  ;;  %4796 = vmatprep.mubr.msk.f32.mxu0 %vm280_vm0, %v5733_v2  ;;  %v5764_v2 = vld [vmem:[%s5383_s9 + $0xf8] sm:$0xff]  ;;  %6980 = vst [vmem:[#allocation28_spill] sm:$0xff] %v5767_v40 }
  0x61   : > { %4746 = vmatprep.mubr.msk.f32.mxu1 %vm280_vm0, %v5730_v5 }
  0x63   : > { %4797 = vmatmul.mubr.msk.f32.gmra.mxu0 %vm280_vm0, %v5747_v10  ;;  %v5787_v10 = vld [vmem:[%s5383_s9 + $0x112] sm:$0xff] }
  0x64   : > { %4747 = vmatmul.mubr.msk.f32.gmra.mxu1 %vm280_vm0, %v5744_v38  ;;  %4799 = vmatprep.mubr.msk.f32.mxu0 %vm280_vm0, %v5753_v62  ;;  %v5784_v62 = vld [vmem:[%s5383_s9 + $0x110] sm:$0xff]  ;;  %6982 = vst [vmem:[#allocation30_spill] sm:$0xff] %v5787_v10 }
  0x65   : > { %4749 = vmatprep.mubr.msk.f32.mxu1 %vm280_vm0, %v5750_v0 }
  0x67   : > { %4800 = vmatmul.mubr.msk.f32.gmra.mxu0 %vm280_vm0, %v5767_v40  ;;  %v5807_v40 = vld [vmem:[%s5383_s9 + $0x12a] sm:$0xff] }
  0x68   : > { %4750 = vmatmul.mubr.msk.f32.gmra.mxu1 %vm280_vm0, %v5764_v2  ;;  %4802 = vmatprep.mubr.msk.f32.mxu0 %vm280_vm0, %v5773_v58  ;;  %v5804_v58 = vld [vmem:[%s5383_s9 + $0x128] sm:$0xff]  ;;  %6986 = vst [vmem:[#allocation34_spill] sm:$0xff] %v5807_v40 }
  0x69   : > { %4752 = vmatprep.mubr.msk.f32.mxu1 %vm280_vm0, %v5770_v60  ;;  %6985 = vst [vmem:[#allocation33_spill] sm:$0xff] %v5804_v58 }
  0x6b   : > { %4803 = vmatmul.mubr.msk.f32.gmra.mxu0 %vm280_vm0, %v5787_v10  ;;  %v5827_v10 = vld [vmem:[%s5383_s9 + $0x142] sm:$0xff] }
  0x6c   : > { %4753 = vmatmul.mubr.msk.f32.gmra.mxu1 %vm280_vm0, %v5784_v62  ;;  %4805 = vmatprep.mubr.msk.f32.mxu0 %vm280_vm0, %v5793_v54  ;;  %v5824_v54 = vld [vmem:[%s5383_s9 + $0x140] sm:$0xff]  ;;  %6990 = vst [vmem:[#allocation38_spill] sm:$0xff] %v5827_v10 }
  0x6d   : > { %4755 = vmatprep.mubr.msk.f32.mxu1 %vm280_vm0, %v5790_v56  ;;  %6989 = vst [vmem:[#allocation37_spill] sm:$0xff] %v5824_v54 }
  0x6f   : > { %4806 = vmatmul.mubr.msk.f32.gmra.mxu0 %vm280_vm0, %v5807_v40  ;;  %v5847_v40 = vld [vmem:[%s5383_s9 + $0x15a] sm:$0xff] }
  0x70   : > { %4756 = vmatmul.mubr.msk.f32.gmra.mxu1 %vm280_vm0, %v5804_v58  ;;  %4808 = vmatprep.mubr.msk.f32.mxu0 %vm280_vm0, %v5813_v50  ;;  %v5844_v50 = vld [vmem:[%s5383_s9 + $0x158] sm:$0xff]  ;;  %6994 = vst [vmem:[#allocation42_spill] sm:$0xff] %v5847_v40 }
  0x71   : > { %4758 = vmatprep.mubr.msk.f32.mxu1 %vm280_vm0, %v5810_v52  ;;  %6993 = vst [vmem:[#allocation41_spill] sm:$0xff] %v5844_v50 }
  0x73   : > { %4809 = vmatmul.mubr.msk.f32.gmra.mxu0 %vm280_vm0, %v5827_v10  ;;  %v5867_v10 = vld [vmem:[%s5383_s9 + $0x172] sm:$0xff] }
  0x74   : > { %4759 = vmatmul.mubr.msk.f32.gmra.mxu1 %vm280_vm0, %v5824_v54  ;;  %4811 = vmatprep.mubr.msk.f32.mxu0 %vm280_vm0, %v5833_v46  ;;  %v5864_v46 = vld [vmem:[%s5383_s9 + $0x170] sm:$0xff]  ;;  %6996 = vst [vmem:[#allocation44_spill] sm:$0xff] %v5867_v10 }
  0x75   : > { %4761 = vmatprep.mubr.msk.f32.mxu1 %vm280_vm0, %v5830_v48 }
  0x77   : > { %4812 = vmatmul.mubr.msk.f32.gmra.mxu0 %vm280_vm0, %v5847_v40 }
  0x78   : > { %4762 = vmatmul.mubr.msk.f32.gmra.mxu1 %vm280_vm0, %v5844_v50  ;;  %4814 = vmatprep.mubr.msk.f32.mxu0 %vm280_vm0, %v5853_v36  ;;  %v5884_v36 = vld [vmem:[%s6888_s1 + $0x30] sm:$0xff] }
  0x79   : > { %4764 = vmatprep.mubr.msk.f32.mxu1 %vm280_vm0, %v5850_v42 }
  0x7b   : > { %4815 = vmatmul.mubr.msk.f32.gmra.mxu0 %vm280_vm0, %v5867_v10  ;;  %v5889_v10 = vld [vmem:[%s6888_s1 + $0x40] sm:$0xff] }
  0x7c   : > { %4765 = vmatmul.mubr.msk.f32.gmra.mxu1 %vm280_vm0, %v5864_v46  ;;  %4869 = vmatprep.mubr.msk.f32.mxu0 %vm280_vm0, %v5558_v41  ;;  %v6998_v41 = vld [vmem:[#allocation8_spill] sm:$0xff] }
  0x7d   : > { %4819 = vmatprep.mubr.msk.f32.mxu1 %vm280_vm0, %v5397_v7  ;;  %v6004_v7 = vld [vmem:[%s5383_s9 + $0x181] sm:$0xff] }
  0x7f   : > { %4870 = vmatmul.mubr.msk.f32.vlgmr.msra.gmra.mxu0 %vm280_vm0, %v5578_v45  ;;  %v7001_v45 = vld [vmem:[#allocation10_spill] sm:$0xff] }
  0x80   : > { %4820 = vmatmul.mubr.msk.f32.vlgmr.msra.gmra.mxu1 %vm280_vm0, %v5416_v11  ;;  %4968 = vmatpush3.msra.mxu0 %v5573_v44  ;;  %v6007_v11 = vld [vmem:[%s5383_s9 + $0x180] sm:$0xff]  ;;  %v6021_v44 = vld [vmem:[%s5383_s9 + $0x188] sm:$0xff] }
  0x81   : > { %4918 = vmatpush3.msra.mxu1 %v5568_v43  ;;  %4822 = vmatprep.mubr.msk.f32.mxu1 %vm280_vm0, %v5426_v13  ;;  %6997 = vst [vmem:[#allocation45_spill] sm:$0xff] %v6007_v11  ;;  %v6018_v43 = vld [vmem:[%s5383_s9 + $0x189] sm:$0xff]  ;;  %6999 = vst [vmem:[#allocation8_spill] sm:$0xff] %v6021_v44 }
  0x82   : > { %4872 = vmatprep.mubr.msk.f32.mxu0 %vm280_vm0, %v5588_v47  ;;  %5017 = vmatprep.subr.mxu1 %v5884_v36 }
  0x83   : > { %5067 = vmatprep.subr.mxu0 %v5889_v10  ;;  %4873 = vmatmul.mubr.msk.f32.gmra.mxu0 %vm280_vm0, %v5604_v49 }
  0x84   : > { %4823 = vmatmul.mubr.msk.f32.gmra.mxu1 %vm280_vm0, %v5442_v15  ;;  %4875 = vmatprep.mubr.msk.f32.mxu0 %vm280_vm0, %v5610_v51 }
  0x85   : > { %4825 = vmatprep.mubr.msk.f32.mxu1 %vm280_vm0, %v5448_v17 }
  0x87   : > { %4876 = vmatmul.mubr.msk.f32.gmra.mxu0 %vm280_vm0, %v5624_v53 }
  0x88   : > { %4826 = vmatmul.mubr.msk.f32.gmra.mxu1 %vm280_vm0, %v5462_v19  ;;  %4878 = vmatprep.mubr.msk.f32.mxu0 %vm280_vm0, %v5630_v55 }
  0x89   : > { %4828 = vmatprep.mubr.msk.f32.mxu1 %vm280_vm0, %v5468_v21 }
  0x8b   : > { %4879 = vmatmul.mubr.msk.f32.gmra.mxu0 %vm280_vm0, %v5644_v57 }
  0x8c   : > { %4829 = vmatmul.mubr.msk.f32.gmra.mxu1 %vm280_vm0, %v5482_v23  ;;  %4881 = vmatprep.mubr.msk.f32.mxu0 %vm280_vm0, %v5650_v59 }
  0x8d   : > { %4831 = vmatprep.mubr.msk.f32.mxu1 %vm280_vm0, %v5488_v25 }
  0x8f   : > { %4882 = vmatmul.mubr.msk.f32.gmra.mxu0 %vm280_vm0, %v5664_v61 }
  0x90   : > { %4832 = vmatmul.mubr.msk.f32.gmra.mxu1 %vm280_vm0, %v5502_v27  ;;  %4884 = vmatprep.mubr.msk.f32.mxu0 %vm280_vm0, %v5670_v63 }
  0x91   : > { %4834 = vmatprep.mubr.msk.f32.mxu1 %vm280_vm0, %v5508_v29 }
  0x93   : > { %4885 = vmatmul.mubr.msk.f32.gmra.mxu0 %vm280_vm0, %v5684_v1 }
  0x94   : > { %4835 = vmatmul.mubr.msk.f32.gmra.mxu1 %vm280_vm0, %v5522_v31  ;;  %4887 = vmatprep.mubr.msk.f32.mxu0 %vm280_vm0, %v5690_v3 }
  0x95   : > { %4837 = vmatprep.mubr.msk.f32.mxu1 %vm280_vm0, %v5528_v33 }
  0x97   : > { %4888 = vmatmul.mubr.msk.f32.gmra.mxu0 %vm280_vm0, %v5704_v9 }
  0x98   : > { %4838 = vmatmul.mubr.msk.f32.gmra.mxu1 %vm280_vm0, %v5542_v35  ;;  %4890 = vmatprep.mubr.msk.f32.mxu0 %vm280_vm0, %v5710_v37 }
  0x99   : > { %4840 = vmatprep.mubr.msk.f32.mxu1 %vm280_vm0, %v5387_v4 }
  0x9b   : > { %4891 = vmatmul.mubr.msk.f32.gmra.mxu0 %vm280_vm0, %v5724_v39 }
  0x9c   : > { %4841 = vmatmul.mubr.msk.f32.gmra.mxu1 %vm280_vm0, %v5394_v6  ;;  %4893 = vmatprep.mubr.msk.f32.mxu0 %vm280_vm0, %v5730_v5 }
  0x9d   : > { %4843 = vmatprep.mubr.msk.f32.mxu1 %vm280_vm0, %v5400_v8 }
  0x9f   : > { %4894 = vmatmul.mubr.msk.f32.gmra.mxu0 %vm280_vm0, %v5744_v38 }
  0xa0   : > { %4844 = vmatmul.mubr.msk.f32.gmra.mxu1 %vm280_vm0, %v5419_v12  ;;  %4896 = vmatprep.mubr.msk.f32.mxu0 %vm280_vm0, %v5750_v0 }
  0xa1   : > { %4846 = vmatprep.mubr.msk.f32.mxu1 %vm280_vm0, %v5429_v14 }
  0xa3   : > { %4897 = vmatmul.mubr.msk.f32.gmra.mxu0 %vm280_vm0, %v5764_v2 }
  0xa4   : > { %4847 = vmatmul.mubr.msk.f32.gmra.mxu1 %vm280_vm0, %v5445_v16  ;;  %4899 = vmatprep.mubr.msk.f32.mxu0 %vm280_vm0, %v5770_v60 }
  0xa5   : > { %4849 = vmatprep.mubr.msk.f32.mxu1 %vm280_vm0, %v5451_v18 }
  0xa7   : > { %4900 = vmatmul.mubr.msk.f32.gmra.mxu0 %vm280_vm0, %v5784_v62 }
  0xa8   : > { %4850 = vmatmul.mubr.msk.f32.gmra.mxu1 %vm280_vm0, %v5465_v20  ;;  %4902 = vmatprep.mubr.msk.f32.mxu0 %vm280_vm0, %v5790_v56 }
  0xa9   : > { %4852 = vmatprep.mubr.msk.f32.mxu1 %vm280_vm0, %v5471_v22 }
  0xab   : > { %4903 = vmatmul.mubr.msk.f32.gmra.mxu0 %vm280_vm0, %v5804_v58 }
  0xac   : > { %4853 = vmatmul.mubr.msk.f32.gmra.mxu1 %vm280_vm0, %v5485_v24  ;;  %4905 = vmatprep.mubr.msk.f32.mxu0 %vm280_vm0, %v5810_v52  ;;  %v7024_v52 = vld [vmem:[#allocation30_spill] sm:$0xff] }
  0xad   : > { %4855 = vmatprep.mubr.msk.f32.mxu1 %vm280_vm0, %v5491_v26 }
  0xaf   : > { %4906 = vmatmul.mubr.msk.f32.gmra.mxu0 %vm280_vm0, %v5824_v54 }
  0xb0   : > { %4856 = vmatmul.mubr.msk.f32.gmra.mxu1 %vm280_vm0, %v5505_v28  ;;  %4908 = vmatprep.mubr.msk.f32.mxu0 %vm280_vm0, %v5830_v48 }
  0xb1   : > { %4858 = vmatprep.mubr.msk.f32.mxu1 %vm280_vm0, %v5511_v30 }
  0xb3   : > { %4909 = vmatmul.mubr.msk.f32.gmra.mxu0 %vm280_vm0, %v5844_v50 }
  0xb4   : > { %4859 = vmatmul.mubr.msk.f32.gmra.mxu1 %vm280_vm0, %v5525_v32  ;;  %4911 = vmatprep.mubr.msk.f32.mxu0 %vm280_vm0, %v5850_v42  ;;  %v7000_v42 = vld [vmem:[#allocation9_spill] sm:$0xff] }
  0xb5   : > { %4861 = vmatprep.mubr.msk.f32.mxu1 %vm280_vm0, %v5531_v34 }
  0xb7   : > { %4912 = vmatmul.mubr.msk.f32.gmra.mxu0 %vm280_vm0, %v5864_v46  ;;  %v7002_v46 = vld [vmem:[#allocation11_spill] sm:$0xff] }
  0xb8   : > { %4862 = vmatmul.mubr.msk.f32.gmra.mxu1 %vm280_vm0, %v6998_v41  ;;  %4914 = vmatprep.mubr.msk.f32.mxu0 %vm280_vm0, %v6007_v11  ;;  %v7020_v11 = vld [vmem:[#allocation28_spill] sm:$0xff] }
  0xb9   : > { %4864 = vmatprep.mubr.msk.f32.mxu1 %vm280_vm0, %v6004_v7 }
  0xbb   : > { %4915 = vmatmul.mubr.msk.f32.gmra.mxu0 %vm280_vm0, %v6021_v44 }
  0xbc   : > { %4865 = vmatmul.mubr.msk.f32.gmra.mxu1 %vm280_vm0, %v6018_v43  ;;  %4969 = vmatprep.mubr.msk.f32.mxu0 %vm280_vm0, %v5426_v13  ;;  %v7004_v13 = vld [vmem:[#allocation13_spill] sm:$0xff] }
  0xbd   : > { %4919 = vmatprep.mubr.msk.f32.mxu1 %vm280_vm0, %v7000_v42  ;;  %v7003_v42 = vld [vmem:[#allocation12_spill] sm:$0xff] }
  0xbf   : > { %4970 = vmatmul.mubr.msk.f32.vlgmr.msra.gmra.mxu0 %vm280_vm0, %v5442_v15  ;;  %v7005_v15 = vld [vmem:[#allocation14_spill] sm:$0xff] }
  0xc0   : > { %4920 = vmatmul.mubr.msk.f32.vlgmr.msra.gmra.mxu1 %vm280_vm0, %v7001_v45  ;;  %5068 = vmatpush3.msra.mxu0 %v5889_v10  ;;  %v7017_v10 = vld [vmem:[#allocation26_spill] sm:$0xff] }
  0xc1   : > { %5018 = vmatpush3.msra.mxu1 %v5884_v36  ;;  %4922 = vmatprep.mubr.msk.f32.mxu1 %vm280_vm0, %v7002_v46  ;;  %v7006_v36 = vld [vmem:[#allocation15_spill] sm:$0xff] }
  0xc2   : > { %4972 = vmatprep.mubr.msk.f32.mxu0 %vm280_vm0, %v5448_v17  ;;  %v7007_v17 = vld [vmem:[#allocation16_spill] sm:$0xff] }
  0xc3   : > { %4973 = vmatmul.mubr.msk.f32.gmra.mxu0 %vm280_vm0, %v5462_v19  ;;  %v7008_v19 = vld [vmem:[#allocation17_spill] sm:$0xff] }
  0xc4   : > { %4923 = vmatmul.mubr.msk.f32.gmra.mxu1 %vm280_vm0, %v7003_v42  ;;  %4975 = vmatprep.mubr.msk.f32.mxu0 %vm280_vm0, %v5468_v21  ;;  %v7009_v21 = vld [vmem:[#allocation18_spill] sm:$0xff] }
  0xc5   : > { %4925 = vmatprep.mubr.msk.f32.mxu1 %vm280_vm0, %v7004_v13 }
  0xc7   : > { %4976 = vmatmul.mubr.msk.f32.gmra.mxu0 %vm280_vm0, %v5482_v23  ;;  %v7010_v23 = vld [vmem:[#allocation19_spill] sm:$0xff] }
  0xc8   : > { %4926 = vmatmul.mubr.msk.f32.gmra.mxu1 %vm280_vm0, %v7005_v15  ;;  %4978 = vmatprep.mubr.msk.f32.mxu0 %vm280_vm0, %v5488_v25  ;;  %v7011_v25 = vld [vmem:[#allocation20_spill] sm:$0xff] }
  0xc9   : > { %4928 = vmatprep.mubr.msk.f32.mxu1 %vm280_vm0, %v7006_v36 }
  0xcb   : > { %4979 = vmatmul.mubr.msk.f32.gmra.mxu0 %vm280_vm0, %v5502_v27  ;;  %v7012_v27 = vld [vmem:[#allocation21_spill] sm:$0xff] }
  0xcc   : > { %4929 = vmatmul.mubr.msk.f32.gmra.mxu1 %vm280_vm0, %v7007_v17  ;;  %4981 = vmatprep.mubr.msk.f32.mxu0 %vm280_vm0, %v5508_v29  ;;  %v7013_v29 = vld [vmem:[#allocation22_spill] sm:$0xff] }
  0xcd   : > { %4931 = vmatprep.mubr.msk.f32.mxu1 %vm280_vm0, %v7008_v19 }
  0xcf   : > { %4982 = vmatmul.mubr.msk.f32.gmra.mxu0 %vm280_vm0, %v5522_v31  ;;  %v7014_v31 = vld [vmem:[#allocation23_spill] sm:$0xff] }
  0xd0   : > { %4932 = vmatmul.mubr.msk.f32.gmra.mxu1 %vm280_vm0, %v7009_v21  ;;  %4984 = vmatprep.mubr.msk.f32.mxu0 %vm280_vm0, %v5528_v33  ;;  %v7015_v33 = vld [vmem:[#allocation24_spill] sm:$0xff] }
  0xd1   : > { %4934 = vmatprep.mubr.msk.f32.mxu1 %vm280_vm0, %v7010_v23 }
  0xd3   : > { %4985 = vmatmul.mubr.msk.f32.gmra.mxu0 %vm280_vm0, %v5542_v35  ;;  %v7016_v35 = vld [vmem:[#allocation25_spill] sm:$0xff] }
  0xd4   : > { %4935 = vmatmul.mubr.msk.f32.gmra.mxu1 %vm280_vm0, %v7011_v25  ;;  %4987 = vmatprep.mubr.msk.f32.mxu0 %vm280_vm0, %v5387_v4 }
  0xd5   : > { %4937 = vmatprep.mubr.msk.f32.mxu1 %vm280_vm0, %v7012_v27 }
  0xd7   : > { %4988 = vmatmul.mubr.msk.f32.gmra.mxu0 %vm280_vm0, %v5394_v6 }
  0xd8   : > { %4938 = vmatmul.mubr.msk.f32.gmra.mxu1 %vm280_vm0, %v7013_v29  ;;  %4990 = vmatprep.mubr.msk.f32.mxu0 %vm280_vm0, %v5400_v8  ;;  %v7018_v8 = vld [vmem:[#allocation27_spill] sm:$0xff] }
  0xd9   : > { %4940 = vmatprep.mubr.msk.f32.mxu1 %vm280_vm0, %v7014_v31 }
  0xdb   : > { %4991 = vmatmul.mubr.msk.f32.gmra.mxu0 %vm280_vm0, %v5419_v12 }
  0xdc   : > { %4941 = vmatmul.mubr.msk.f32.gmra.mxu1 %vm280_vm0, %v7015_v33  ;;  %4993 = vmatprep.mubr.msk.f32.mxu0 %vm280_vm0, %v5429_v14 }
  0xdd   : > { %4943 = vmatprep.mubr.msk.f32.mxu1 %vm280_vm0, %v7016_v35 }
  0xdf   : > { %v6097_v4 = vpop.f32.mrf.mxu0  ;;  %4994 = vmatmul.mubr.msk.f32.gmra.mxu0 %vm280_vm0, %v5445_v16  ;;  %v7021_v16 = vld [vmem:[#allocation29_spill] sm:$0xff] }
  0xe0   : > { %v6099_v6 = vpop.f32.mrf.mxu1  ;;  %4944 = vmatmul.mubr.msk.f32.gmra.mxu1 %vm280_vm0, %v7017_v10  ;;  %4996 = vmatprep.mubr.msk.f32.mxu0 %vm280_vm0, %v5451_v18 }
  0xe1   : > { %4946 = vmatprep.mubr.msk.f32.mxu1 %vm280_vm0, %v7018_v8  ;;  %v6109_v12 = vpop.f32.mrf.mxu0 }
  0xe2   : > { %v6111_v45 = vpop.f32.mrf.mxu1 }
  0xe3   : > { %v6113_v14 = vpop.f32.mrf.mxu0  ;;  %4997 = vmatmul.mubr.msk.f32.gmra.mxu0 %vm280_vm0, %v5465_v20  ;;  %v7025_v20 = vld [vmem:[#allocation32_spill] sm:$0xff] }
  0xe4   : > { %v6115_v44 = vpop.f32.mrf.mxu1  ;;  %4947 = vmatmul.mubr.msk.f32.gmra.mxu1 %vm280_vm0, %v7020_v11  ;;  %4999 = vmatprep.mubr.msk.f32.mxu0 %vm280_vm0, %v5471_v22 }
  0xe5   : > { %7019 = vst [vmem:[#allocation9_spill] sm:$0xff] %v6115_v44  ;;  %4949 = vmatprep.mubr.msk.f32.mxu1 %vm280_vm0, %v7021_v16  ;;  %v6125_v18 = vpop.f32.mrf.mxu0  ;;  %v7032_v44 = vld [vmem:[#allocation38_spill] sm:$0xff] }
  0xe6   : > { %v6127_v50 = vpop.f32.mrf.mxu1 }
  0xe7   : > { %7022 = vst [vmem:[#allocation10_spill] sm:$0xff] %v6127_v50  ;;  %v6129_v48 = vpop.f32.mrf.mxu0  ;;  %5000 = vmatmul.mubr.msk.f32.gmra.mxu0 %vm280_vm0, %v5485_v24  ;;  %v7029_v24 = vld [vmem:[#allocation36_spill] sm:$0xff] }
  0xe8   : > { %v6131_v54 = vpop.f32.mrf.mxu1  ;;  %4950 = vmatmul.mubr.msk.f32.gmra.mxu1 %vm280_vm0, %v7024_v52  ;;  %5002 = vmatprep.mubr.msk.f32.mxu0 %vm280_vm0, %v5491_v26 }
  0xe9   : > { %7023 = vst [vmem:[#allocation11_spill] sm:$0xff] %v6131_v54  ;;  %4952 = vmatprep.mubr.msk.f32.mxu1 %vm280_vm0, %v7025_v20  ;;  %v6141_v22 = vpop.f32.mrf.mxu0  ;;  %v7028_v54 = vld [vmem:[#allocation34_spill] sm:$0xff] }
  0xea   : > { %v6143_v58 = vpop.f32.mrf.mxu1 }
  0xeb   : > { %7026 = vst [vmem:[#allocation12_spill] sm:$0xff] %v6143_v58  ;;  %v6145_v50 = vpop.f32.mrf.mxu0  ;;  %5003 = vmatmul.mubr.msk.f32.gmra.mxu0 %vm280_vm0, %v5505_v28  ;;  %v7033_v28 = vld [vmem:[#allocation40_spill] sm:$0xff] }
  0xec   : > { %v6147_v56 = vpop.f32.mrf.mxu1  ;;  %4953 = vmatmul.mubr.msk.f32.gmra.mxu1 %vm280_vm0, %v7028_v54  ;;  %5005 = vmatprep.mubr.msk.f32.mxu0 %vm280_vm0, %v5511_v30 }
  0xed   : > { %7027 = vst [vmem:[#allocation13_spill] sm:$0xff] %v6147_v56  ;;  %4955 = vmatprep.mubr.msk.f32.mxu1 %vm280_vm0, %v7029_v24  ;;  %v6157_v26 = vpop.f32.mrf.mxu0 }
  0xee   : > { %v6159_v20 = vpop.f32.mrf.mxu1 }
  0xef   : > { %7030 = vst [vmem:[#allocation14_spill] sm:$0xff] %v6159_v20  ;;  %v6161_v58 = vpop.f32.mrf.mxu0  ;;  %5006 = vmatmul.mubr.msk.f32.gmra.mxu0 %vm280_vm0, %v5525_v32  ;;  %v7036_v32 = vld [vmem:[#allocation43_spill] sm:$0xff] }
  0xf0   : > { %v6163_v56 = vpop.f32.mrf.mxu1  ;;  %4956 = vmatmul.mubr.msk.f32.gmra.mxu1 %vm280_vm0, %v7032_v44  ;;  %5008 = vmatprep.mubr.msk.f32.mxu0 %vm280_vm0, %v5531_v34 }
  0xf1   : > { %7031 = vst [vmem:[#allocation15_spill] sm:$0xff] %v6163_v56  ;;  %4958 = vmatprep.mubr.msk.f32.mxu1 %vm280_vm0, %v7033_v28  ;;  %v6173_v30 = vpop.f32.mrf.mxu0  ;;  %v6194_v28 = vld [vmem:[%s5383_s9 + $0x182] sm:$0xff] }
  0xf2   : > { %v6175_v20 = vpop.f32.mrf.mxu1  ;;  %7038 = vst [vmem:[#allocation19_spill] sm:$0xff] %v6194_v28 }
  0xf3   : > { %7034 = vst [vmem:[#allocation16_spill] sm:$0xff] %v6175_v20  ;;  %v6177_v24 = vpop.f32.mrf.mxu0  ;;  %5009 = vmatmul.mubr.msk.f32.gmra.mxu0 %vm280_vm0, %v6998_v41  ;;  %v4231_v41 = vld [vmem:[%s5383_s9 + $0x1a1] sm:$0xff] }
  0xf4   : > { %v6179_v56 = vpop.f32.mrf.mxu1  ;;  %4959 = vmatmul.mubr.msk.f32.gmra.mxu1 %vm280_vm0, %v5847_v40  ;;  %5011 = vmatprep.mubr.msk.f32.mxu0 %vm280_vm0, %v6004_v7  ;;  %v7040_v40 = vld [vmem:[#allocation44_spill] sm:$0xff] }
  0xf5   : > { %7035 = vst [vmem:[#allocation17_spill] sm:$0xff] %v6179_v56  ;;  %4961 = vmatprep.mubr.msk.f32.mxu1 %vm280_vm0, %v7036_v32  ;;  %v6189_v34 = vpop.f32.mrf.mxu0  ;;  %v4230_v56 = vld [vmem:[%s5383_s9 + $0x199] sm:$0xff]  ;;  %v6209_v7 = vld [vmem:[%s5383_s9 + $0x18a] sm:$0xff] }
  0xf6   : > { %v6191_v20 = vpop.f32.mrf.mxu1  ;;  %7041 = vst [vmem:[#allocation21_spill] sm:$0xff] %v6209_v7 }
  0xf7   : > { %7037 = vst [vmem:[#allocation18_spill] sm:$0xff] %v6191_v20  ;;  %v6197_v44 = vpop.f32.mrf.mxu0  ;;  %5012 = vmatmul.mubr.msk.f32.gmra.mxu0 %vm280_vm0, %v6018_v43 }
  0xf8   : > { %v6199_v54 = vpop.f32.mrf.mxu1  ;;  %4962 = vmatmul.mubr.msk.f32.gmra.mxu1 %vm280_vm0, %v7040_v40  ;;  %5014 = vmatprep.mubr.msk.f32.mxu0 %vm280_vm0, %v4230_v56 }
  0xf9   : > { %7039 = vst [vmem:[#allocation20_spill] sm:$0xff] %v6199_v54  ;;  %4964 = vmatprep.mubr.msk.f32.mxu1 %vm280_vm0, %v6194_v28  ;;  %v6212_v32 = vpop.f32.mrf.mxu0 }
  0xfa   : > { %v6214_v20 = vpop.f32.mrf.mxu1 }
  0xfb   : > { %7042 = vst [vmem:[#allocation22_spill] sm:$0xff] %v6214_v20  ;;  %v6216_v52 = vpop.f32.mrf.mxu0  ;;  %5015 = vmatmul.mubr.msk.f32.gmra.mxu0 %vm280_vm0, %v4231_v41 }
  0xfc   : > { %v6218_v54 = vpop.f32.mrf.mxu1  ;;  %4965 = vmatmul.mubr.msk.f32.gmra.mxu1 %vm280_vm0, %v6209_v7  ;;  %5069 = vmatprep.mubr.msk.f32.mxu0 %vm280_vm0, %v7002_v46 }
  0xfd   : > { %7043 = vst [vmem:[#allocation23_spill] sm:$0xff] %v6218_v54  ;;  %5019 = vmatprep.mubr.msk.f32.mxu1 %vm280_vm0, %v5588_v47  ;;  %v6227_v56 = vpop.f32.mrf.mxu0 }
  0xfe   : > { %v6229_v40 = vpop.f32.mrf.mxu1 }
  0xff   : > { %7044 = vst [vmem:[#allocation24_spill] sm:$0xff] %v6229_v40  ;;  %v4771_v20 = vpop.f32.mrf.mxu0  ;;  %5070 = vmatmul.mubr.msk.f32.vlgmr.msra.gmra.mxu0 %vm280_vm0, %v7003_v42 }
 0x100   : > { %v4721_v43 = vpop.f32.mrf.mxu1  ;;  %5020 = vmatmul.mubr.msk.f32.vlgmr.msra.gmra.mxu1 %vm280_vm0, %v5604_v49  ;;  %5072 = vmatprep.mubr.msk.f32.mxu0 %vm280_vm0, %v7004_v13 }
 0x101   : > { %v770_v41 = vadd.f32 %v4721_v43, %v6097_v4  ;;  %5022 = vmatprep.mubr.msk.f32.mxu1 %vm280_vm0, %v5610_v51  ;;  %v1119_v46 = vpop.f32.mrf.mxu0 }
 0x102   : > { %v764_v47 = vpop.f32.mrf.mxu1 }
 0x103   : > { %v6240_v54 = vadd.f32 %v4771_v20, %v770_v41  ;;  %v765_v40 = vadd.f32 %v764_v47, %v6109_v12  ;;  %v4774_v28 = vpop.f32.mrf.mxu0  ;;  %5073 = vmatmul.mubr.msk.f32.gmra.mxu0 %vm280_vm0, %v7005_v15 }
 0x104   : > { %v4724_v7 = vpop.f32.mrf.mxu1  ;;  %5023 = vmatmul.mubr.msk.f32.gmra.mxu1 %vm280_vm0, %v5624_v53  ;;  %5075 = vmatprep.mubr.msk.f32.mxu0 %vm280_vm0, %v7006_v36 }
 0x105   : > { %v6247_v49 = vadd.f32 %v1119_v46, %v765_v40  ;;  %v780_v51 = vadd.f32 %v4724_v7, %v6113_v14  ;;  %5025 = vmatprep.mubr.msk.f32.mxu1 %vm280_vm0, %v5630_v55  ;;  %v1129_v13 = vpop.f32.mrf.mxu0 }
 0x106   : > { %v774_v42 = vpop.f32.mrf.mxu1 }
 0x107   : > { %v6254_v4 = vadd.f32 %v4774_v28, %v780_v51  ;;  %v775_v12 = vadd.f32 %v774_v42, %v6125_v18  ;;  %v4777_v20 = vpop.f32.mrf.mxu0  ;;  %5076 = vmatmul.mubr.msk.f32.gmra.mxu0 %vm280_vm0, %v7007_v17 }
 0x108   : > { %v4727_v53 = vpop.f32.mrf.mxu1  ;;  %5026 = vmatmul.mubr.msk.f32.gmra.mxu1 %vm280_vm0, %v5644_v57  ;;  %5078 = vmatprep.mubr.msk.f32.mxu0 %vm280_vm0, %v7008_v19 }
 0x109   : > { %v6261_v15 = vadd.f32 %v1129_v13, %v775_v12  ;;  %v790_v55 = vadd.f32 %v4727_v53, %v6129_v48  ;;  %5028 = vmatprep.mubr.msk.f32.mxu1 %vm280_vm0, %v5650_v59  ;;  %v1139_v14 = vpop.f32.mrf.mxu0 }
 0x10a   : > { %v784_v36 = vpop.f32.mrf.mxu1 }
 0x10b   : > { %v6268_v18 = vadd.f32 %v4777_v20, %v790_v55  ;;  %v785_v28 = vadd.f32 %v784_v36, %v6141_v22  ;;  %v4780_v7 = vpop.f32.mrf.mxu0  ;;  %5079 = vmatmul.mubr.msk.f32.gmra.mxu0 %vm280_vm0, %v7009_v21 }
 0x10c   : > { %v4730_v57 = vpop.f32.mrf.mxu1  ;;  %5029 = vmatmul.mubr.msk.f32.gmra.mxu1 %vm280_vm0, %v5664_v61  ;;  %5081 = vmatprep.mubr.msk.f32.mxu0 %vm280_vm0, %v7010_v23 }
 0x10d   : > { %v6275_v48 = vadd.f32 %v1139_v14, %v785_v28  ;;  %v800_v59 = vadd.f32 %v4730_v57, %v6145_v50  ;;  %5031 = vmatprep.mubr.msk.f32.mxu1 %vm280_vm0, %v5670_v63  ;;  %v1149_v19 = vpop.f32.mrf.mxu0  ;;  %v7047_v14 = vld [vmem:[#allocation31_spill] sm:$0xff] }
 0x10e   : > { %v794_v17 = vpop.f32.mrf.mxu1 }
 0x10f   : > { %v6282_v22 = vadd.f32 %v4780_v7, %v800_v59  ;;  %v795_v40 = vadd.f32 %v794_v17, %v6157_v26  ;;  %v4783_v43 = vpop.f32.mrf.mxu0  ;;  %5082 = vmatmul.mubr.msk.f32.gmra.mxu0 %vm280_vm0, %v7011_v25  ;;  %v7049_v7 = vld [vmem:[#allocation10_spill] sm:$0xff] }
 0x110   : > { %v4733_v61 = vpop.f32.mrf.mxu1  ;;  %5032 = vmatmul.mubr.msk.f32.gmra.mxu1 %vm280_vm0, %v5684_v1  ;;  %5084 = vmatprep.mubr.msk.f32.mxu0 %vm280_vm0, %v7012_v27 }
 0x111   : > { %v6289_v50 = vadd.f32 %v1149_v19, %v795_v40  ;;  %v810_v63 = vadd.f32 %v4733_v61, %v6161_v58  ;;  %5034 = vmatprep.mubr.msk.f32.mxu1 %vm280_vm0, %v5690_v3  ;;  %v1159_v23 = vpop.f32.mrf.mxu0  ;;  %v7050_v19 = vld [vmem:[#allocation33_spill] sm:$0xff]  ;;  %v7051_v40 = vld [vmem:[#allocation34_spill] sm:$0xff] }
 0x112   : > { %v804_v21 = vpop.f32.mrf.mxu1 }
 0x113   : > { %v6296_v26 = vadd.f32 %v4783_v43, %v810_v63  ;;  %v805_v41 = vadd.f32 %v804_v21, %v6173_v30  ;;  %v4786_v47 = vpop.f32.mrf.mxu0  ;;  %5085 = vmatmul.mubr.msk.f32.gmra.mxu0 %vm280_vm0, %v7013_v29  ;;  %v7052_v43 = vld [vmem:[#allocation11_spill] sm:$0xff] }
 0x114   : > { %v4736_v1 = vpop.f32.mrf.mxu1  ;;  %5035 = vmatmul.mubr.msk.f32.gmra.mxu1 %vm280_vm0, %v5704_v9  ;;  %5087 = vmatprep.mubr.msk.f32.mxu0 %vm280_vm0, %v7014_v31  ;;  %v7053_v21 = vld [vmem:[#allocation35_spill] sm:$0xff] }
 0x115   : > { %v6303_v58 = vadd.f32 %v1159_v23, %v805_v41  ;;  %v820_v3 = vadd.f32 %v4736_v1, %v6177_v24  ;;  %5037 = vmatprep.mubr.msk.f32.mxu1 %vm280_vm0, %v5710_v37  ;;  %v1169_v27 = vpop.f32.mrf.mxu0  ;;  %v7054_v23 = vld [vmem:[#allocation36_spill] sm:$0xff] }
 0x116   : > { %v814_v25 = vpop.f32.mrf.mxu1 }
 0x117   : > { %v6310_v30 = vadd.f32 %v4786_v47, %v820_v3  ;;  %v815_v46 = vadd.f32 %v814_v25, %v6189_v34  ;;  %v4789_v51 = vpop.f32.mrf.mxu0  ;;  %5088 = vmatmul.mubr.msk.f32.gmra.mxu0 %vm280_vm0, %v7015_v33  ;;  %v7055_v3 = vld [vmem:[#allocation12_spill] sm:$0xff] }
 0x118   : > { %v4739_v9 = vpop.f32.mrf.mxu1  ;;  %5038 = vmatmul.mubr.msk.f32.gmra.mxu1 %vm280_vm0, %v5724_v39  ;;  %5090 = vmatprep.mubr.msk.f32.mxu0 %vm280_vm0, %v7016_v35 }
 0x119   : > { %v6317_v29 = vadd.f32 %v1169_v27, %v815_v46  ;;  %v830_v37 = vadd.f32 %v4739_v9, %v6197_v44  ;;  %5040 = vmatprep.mubr.msk.f32.mxu1 %vm280_vm0, %v5730_v5  ;;  %v1179_v24 = vpop.f32.mrf.mxu0  ;;  %v7056_v9 = vld [vmem:[#allocation37_spill] sm:$0xff] }
 0x11a   : > { %v824_v31 = vpop.f32.mrf.mxu1 }
 0x11b   : > { %v6324_v34 = vadd.f32 %v4789_v51, %v830_v37  ;;  %v825_v42 = vadd.f32 %v824_v31, %v6212_v32  ;;  %v4792_v13 = vpop.f32.mrf.mxu0  ;;  %5091 = vmatmul.mubr.msk.f32.gmra.mxu0 %vm280_vm0, %v7017_v10  ;;  %v7057_v51 = vld [vmem:[#allocation38_spill] sm:$0xff]  ;;  %v7058_v31 = vld [vmem:[#allocation13_spill] sm:$0xff] }
 0x11c   : > { %v4742_v39 = vpop.f32.mrf.mxu1  ;;  %5041 = vmatmul.mubr.msk.f32.gmra.mxu1 %vm280_vm0, %v5744_v38  ;;  %5093 = vmatprep.mubr.msk.f32.mxu0 %vm280_vm0, %v7018_v8 }
 0x11d   : > { %v6331_v44 = vadd.f32 %v1179_v24, %v825_v42  ;;  %v840_v5 = vadd.f32 %v4742_v39, %v6216_v52  ;;  %5043 = vmatprep.mubr.msk.f32.mxu1 %vm280_vm0, %v5750_v0  ;;  %v1189_v35 = vpop.f32.mrf.mxu0  ;;  %v7059_v42 = vld [vmem:[#allocation39_spill] sm:$0xff]  ;;  %v7060_v39 = vld [vmem:[#allocation40_spill] sm:$0xff] }
 0x11e   : > { %v834_v33 = vpop.f32.mrf.mxu1 }
 0x11f   : > { %v6338_v32 = vadd.f32 %v4792_v13, %v840_v5  ;;  %v835_v12 = vadd.f32 %v834_v33, %v6227_v56  ;;  %v4795_v53 = vpop.f32.mrf.mxu0  ;;  %5094 = vmatmul.mubr.msk.f32.gmra.mxu0 %vm280_vm0, %v7020_v11  ;;  %v7045_v11 = vld [vmem:[#allocation30_spill] sm:$0xff]  ;;  %v4193_v33 = vld [vmem:[%s5383_s9 + $0x168] sm:$0xff] }
 0x120   : > { %v4745_v38 = vpop.f32.mrf.mxu1  ;;  %5044 = vmatmul.mubr.msk.f32.gmra.mxu1 %vm280_vm0, %v5764_v2  ;;  %5096 = vmatprep.mubr.msk.f32.mxu0 %vm280_vm0, %v7021_v16  ;;  %v7048_v16 = vld [vmem:[#allocation32_spill] sm:$0xff] }
 0x121   : > { %v6345_v52 = vadd.f32 %v1189_v35, %v835_v12  ;;  %v850_v0 = vadd.f32 %v4745_v38, %v6099_v6  ;;  %5046 = vmatprep.mubr.msk.f32.mxu1 %vm280_vm0, %v5770_v60  ;;  %v1199_v8 = vpop.f32.mrf.mxu0  ;;  %v7046_v60 = vld [vmem:[#allocation9_spill] sm:$0xff]  ;;  %v7061_v38 = vld [vmem:[#allocation14_spill] sm:$0xff] }
 0x122   : > { %v844_v10 = vpop.f32.mrf.mxu1  ;;  %v4323_v35 = vld [vmem:[%s5383_s9 + $0x16a] sm:$0xff] }
 0x123   : > { %v6352_v56 = vadd.f32 %v4795_v53, %v850_v0  ;;  %v845_v20 = vadd.f32 %v844_v10, %v6111_v45  ;;  %v4798_v55 = vpop.f32.mrf.mxu0  ;;  %5097 = vmatmul.mubr.msk.f32.gmra.mxu0 %vm280_vm0, %v7045_v11 }
 0x124   : > { %v4748_v2 = vpop.f32.mrf.mxu1  ;;  %5047 = vmatmul.mubr.msk.f32.gmra.mxu1 %vm280_vm0, %v5784_v62  ;;  %5099 = vmatprep.mubr.msk.f32.mxu0 %vm280_vm0, %v7048_v16 }
 0x125   : > { %v6359_v6 = vadd.f32 %v1199_v8, %v845_v20  ;;  %v860_v36 = vadd.f32 %v4748_v2, %v7046_v60  ;;  %5049 = vmatprep.mubr.msk.f32.mxu1 %vm280_vm0, %v7047_v14  ;;  %v1209_v45 = vpop.f32.mrf.mxu0  ;;  %v7062_v8 = vld [vmem:[#allocation41_spill] sm:$0xff]  ;;  %v7063_v20 = vld [vmem:[#allocation42_spill] sm:$0xff] }
 0x126   : > { %v854_v28 = vpop.f32.mrf.mxu1  ;;  %v4194_v60 = vld [vmem:[%s5383_s9 + $0x170] sm:$0xff] }
 0x127   : > { %v6366_v57 = vadd.f32 %v4798_v55, %v860_v36  ;;  %v855_v59 = vadd.f32 %v854_v28, %v7049_v7  ;;  %v4801_v17 = vpop.f32.mrf.mxu0  ;;  %5100 = vmatmul.mubr.msk.f32.gmra.mxu0 %vm280_vm0, %v7051_v40  ;;  %v7065_v55 = vld [vmem:[#allocation15_spill] sm:$0xff]  ;;  %v4324_v36 = vld [vmem:[%s5383_s9 + $0x172] sm:$0xff] }
 0x128   : > { %v4751_v62 = vpop.f32.mrf.mxu1  ;;  %5050 = vmatmul.mubr.msk.f32.gmra.mxu1 %vm280_vm0, %v7050_v19  ;;  %5102 = vmatprep.mubr.msk.f32.mxu0 %vm280_vm0, %v7054_v23  ;;  %v7069_v19 = vld [vmem:[#allocation17_spill] sm:$0xff] }
 0x129   : > { %v6373_v61 = vadd.f32 %v1209_v45, %v855_v59  ;;  %v870_v63 = vadd.f32 %v4751_v62, %v7052_v43  ;;  %5052 = vmatprep.mubr.msk.f32.mxu1 %vm280_vm0, %v7053_v21  ;;  %v1219_v1 = vpop.f32.mrf.mxu0  ;;  %v7067_v45 = vld [vmem:[#allocation16_spill] sm:$0xff]  ;;  %v7070_v43 = vld [vmem:[#allocation45_spill] sm:$0xff] }
 0x12a   : > { %v864_v41 = vpop.f32.mrf.mxu1 }
 0x12b   : > { %v6380_v47 = vadd.f32 %v4801_v17, %v870_v63  ;;  %v865_v25 = vadd.f32 %v864_v41, %v7055_v3  ;;  %v4804_v46 = vpop.f32.mrf.mxu0  ;;  %5103 = vmatmul.mubr.msk.f32.gmra.mxu0 %vm280_vm0, %v7057_v51  ;;  %v7071_v63 = vld [vmem:[#allocation19_spill] sm:$0xff]  ;;  %v7074_v51 = vld [vmem:[#allocation8_spill] sm:$0xff] }
 0x12c   : > { %v4754_v27 = vpop.f32.mrf.mxu1  ;;  %5053 = vmatmul.mubr.msk.f32.gmra.mxu1 %vm280_vm0, %v7056_v9  ;;  %5105 = vmatprep.mubr.msk.f32.mxu0 %vm280_vm0, %v7060_v39  ;;  %v4197_v41 = vld [vmem:[%s5383_s9 + $0x198] sm:$0xff] }
 0x12d   : > { %v6387_v37 = vadd.f32 %v1219_v1, %v865_v25  ;;  %v880_v24 = vadd.f32 %v4754_v27, %v7058_v31  ;;  %5055 = vmatprep.mubr.msk.f32.mxu1 %vm280_vm0, %v7059_v42  ;;  %v1229_v5 = vpop.f32.mrf.mxu0  ;;  %v4327_v1 = vld [vmem:[%s5383_s9 + $0x19a] sm:$0xff]  ;;  %v7075_v31 = vld [vmem:[#allocation21_spill] sm:$0xff]  ;;  %v7077_v42 = vld [vmem:[#allocation20_spill] sm:$0xff] }
 0x12e   : > { %v874_v13 = vpop.f32.mrf.mxu1  ;;  %v7073_v25 = vld [vmem:[#allocation18_spill] sm:$0xff] }
 0x12f   : > { %v6396_v12 = vadd.f32 %v4804_v46, %v880_v24  ;;  %v875_v53 = vadd.f32 %v874_v13, %v7061_v38  ;;  %v4807_v10 = vpop.f32.mrf.mxu0  ;;  %5106 = vmatmul.mubr.msk.f32.gmra.mxu0 %vm280_vm0, %v7063_v20  ;;  %v4198_v13 = vld [vmem:[%s5383_s9 + $0x1a0] sm:$0xff] }
 0x130   : > { %v4757_v0 = vpop.f32.mrf.mxu1  ;;  %5056 = vmatmul.mubr.msk.f32.gmra.mxu1 %vm280_vm0, %v7062_v8  ;;  %5108 = vmatprep.mubr.msk.f32.mxu0 %vm280_vm0, %v4323_v35 }
 0x131   : > { %v6403_v2 = vadd.f32 %v1229_v5, %v875_v53  ;;  %v890_v11 = vadd.f32 %v4757_v0, %v7065_v55  ;;  %5058 = vmatprep.mubr.msk.f32.mxu1 %vm280_vm0, %v4193_v33  ;;  %v1239_v16 = vpop.f32.mrf.mxu0  ;;  %v4328_v5 = vld [vmem:[%s5383_s9 + $0x1a2] sm:$0xff]  ;;  %v7079_v53 = vld [vmem:[#allocation22_spill] sm:$0xff]  ;;  %s3731_s9 = sshll.u32 %s6715_s7, 4  ;;  %s6813_s9 = int_to_ptr.vmem [resolvable:$true] %s3731_s9 }
 0x132   : > { %v884_v14 = vpop.f32.mrf.mxu1  ;;  %v7081_v55 = vld [vmem:[#allocation23_spill] sm:$0xff]  ;;  %s5182_s21 = scalar_lea.vmem %s6813_s9, 4096  ;;  %p5189_p1 = scmp.lt.s32.totalorder %s6813_s9, %s5187_s26 }
 0x133   : > { %7064 = vst [vmem:[#allocation25_spill] sm:$0xff] %v6403_v2  ;;  %v6410_v28 = vadd.f32 %v4807_v10, %v890_v11  ;;  %v885_v7 = vadd.f32 %v884_v14, %v7067_v45  ;;  %v4810_v62 = vpop.f32.mrf.mxu0  ;;  %5109 = vmatmul.mubr.msk.f32.gmra.mxu0 %vm280_vm0, %v4324_v36  ;;  %p5183_p12 = scmp.ne.s32.totalorder %s6813_s9, %s5182_s21  ;;  %p5190_p2 = scmp.lt.s32.totalorder %s5188_s27, %s5182_s21 }
 0x134   : > { %v4760_v59 = vpop.f32.mrf.mxu1  ;;  %5059 = vmatmul.mubr.msk.f32.gmra.mxu1 %vm280_vm0, %v4194_v60  ;;  %5111 = vmatprep.mubr.msk.f32.mxu0 %vm280_vm0, %v7071_v63 }
 0x135   : > { %7066 = vst [vmem:[#allocation26_spill] sm:$0xff] %v6410_v28  ;;  %v6415_v17 = vadd.f32 %v1239_v16, %v885_v7  ;;  %v900_v40 = vadd.f32 %v4760_v59, %v7069_v19  ;;  %5061 = vmatprep.mubr.msk.f32.mxu1 %vm280_vm0, %v7070_v43  ;;  %v1249_v23 = vpop.f32.mrf.mxu0  ;;  %v7083_v16 = vld [vmem:[#allocation24_spill] sm:$0xff]  ;;  %p5184_p13 = pnand %p5183_p12, %p5354_p4  ;;  %p5191_p3 = por %p5190_p2, %p5189_p1 }
 0x136   : > { %v894_v21 = vpop.f32.mrf.mxu1 }
 0x137   : > { %7068 = vst [vmem:[#allocation27_spill] sm:$0xff] %v6415_v17  ;;  %v6424_v3 = vadd.f32 %v4810_v62, %v900_v40  ;;  %v895_v27 = vadd.f32 %v894_v21, %v7073_v25  ;;  %v4813_v9 = vpop.f32.mrf.mxu0  ;;  %5112 = vmatmul.mubr.msk.f32.gmra.mxu0 %vm280_vm0, %v7075_v31  ;;  %p5185_p0 = pneg %p5184_p13 }
 0x138   : > { %v4763_v46 = vpop.f32.mrf.mxu1  ;;  %5062 = vmatmul.mubr.msk.f32.gmra.mxu1 %vm280_vm0, %v7074_v51  ;;  %5114 = vmatprep.mubr.msk.f32.mxu0 %vm280_vm0, %v4327_v1 }
 0x139   : > { %7072 = vst [vmem:[#allocation28_spill] sm:$0xff] %v6424_v3  ;;  %v6431_v24 = vadd.f32 %v1249_v23, %v895_v27  ;;  %v910_v39 = vadd.f32 %v4763_v46, %v7077_v42  ;;  %5064 = vmatprep.mubr.msk.f32.mxu1 %vm280_vm0, %v4197_v41  ;;  %v1259_v35 = vpop.f32.mrf.mxu0  ;;  %p5192_p5 = pnand %p5191_p3, %p5185_p0 }
 0x13a   : > { %v904_v33 = vpop.f32.mrf.mxu1 }
 0x13b   : > { %7076 = vst [vmem:[#allocation29_spill] sm:$0xff] %v6431_v24  ;;  %v6438_v38 = vadd.f32 %v4813_v9, %v910_v39  ;;  %v905_v0 = vadd.f32 %v904_v33, %v7079_v53  ;;  %v4816_v8 = vpop.f32.mrf.mxu0  ;;  %5115 = vmatmul.mubr.msk.f32.gmra.mxu0 %vm280_vm0, %v4328_v5 }
 0x13c   : > { %v4766_v10 = vpop.f32.mrf.mxu1  ;;  %5065 = vmatmul.mubr.msk.f32.gmra.mxu1 %vm280_vm0, %v4198_v13 }
 0x13d   : > { %7078 = vst [vmem:[#allocation43_spill] sm:$0xff] %v6438_v38  ;;  %v6443_v20 = vadd.f32 %v1259_v35, %v905_v0  ;;  %v920_v11 = vadd.f32 %v4766_v10, %v7081_v55  ;;  %v1269_v36 = vpop.f32.mrf.mxu0 }
 0x13e   : > { %v914_v60 = vpop.f32.mrf.mxu1 }
 0x13f   : > { %7080 = vst [vmem:[#allocation44_spill] sm:$0xff] %v6443_v20  ;;  %v6446_v14 = vadd.f32 %v4816_v8, %v920_v11  ;;  %v915_v45 = vadd.f32 %v914_v60, %v7083_v16  ;;  %v4871_v59 = vpop.f32.mrf.mxu0 }
 0x140   : > { %v4821_v7 = vpop.f32.mrf.mxu1 }
 0x141   : > { %7082 = vst [vmem:[#allocation30_spill] sm:$0xff] %v6446_v14  ;;  %v6449_v62 = vadd.f32 %v1269_v36, %v915_v45  ;;  %v6451_v19 = vadd.f32 %v4871_v59, %v4821_v7  ;;  %v1862_v43 = vpop.f32.mrf.mxu0 }
 0x142   : > { %v1541_v40 = vpop.f32.mrf.mxu1 }
 0x143   : > { %7084 = vst [vmem:[#allocation9_spill] sm:$0xff] %v6449_v62  ;;  %v6453_v63 = vadd.f32 %v1862_v43, %v1541_v40  ;;  %v4874_v23 = vpop.f32.mrf.mxu0 }
 0x144   : > { %v4824_v21 = vpop.f32.mrf.mxu1 }
 0x145   : > { %v6455_v41 = vadd.f32 %v4874_v23, %v4824_v21  ;;  %v1872_v25 = vpop.f32.mrf.mxu0 }
 0x146   : > { %v1551_v1 = vpop.f32.mrf.mxu1 }
 0x147   : > { %v6457_v27 = vadd.f32 %v1872_v25, %v1551_v1  ;;  %v4877_v9 = vpop.f32.mrf.mxu0 }
 0x148   : > { %v4827_v46 = vpop.f32.mrf.mxu1 }
 0x149   : > { %v6459_v51 = vadd.f32 %v4877_v9, %v4827_v46  ;;  %v1882_v42 = vpop.f32.mrf.mxu0 }
 0x14a   : > { %v1561_v31 = vpop.f32.mrf.mxu1 }
 0x14b   : > { %v6461_v39 = vadd.f32 %v1882_v42, %v1561_v31  ;;  %v4880_v5 = vpop.f32.mrf.mxu0 }
 0x14c   : > { %v4830_v13 = vpop.f32.mrf.mxu1 }
 0x14d   : > { %v6463_v33 = vadd.f32 %v4880_v5, %v4830_v13  ;;  %v1892_v53 = vpop.f32.mrf.mxu0 }
 0x14e   : > { %v1571_v35 = vpop.f32.mrf.mxu1 }
 0x14f   : > { %v6465_v0 = vadd.f32 %v1892_v53, %v1571_v35  ;;  %v4883_v8 = vpop.f32.mrf.mxu0 }
 0x150   : > { %v4833_v10 = vpop.f32.mrf.mxu1 }
 0x151   : > { %v6467_v55 = vadd.f32 %v4883_v8, %v4833_v10  ;;  %v1902_v60 = vpop.f32.mrf.mxu0 }
 0x152   : > { %v1581_v11 = vpop.f32.mrf.mxu1 }
 0x153   : > { %v6469_v36 = vadd.f32 %v1902_v60, %v1581_v11  ;;  %v4886_v45 = vpop.f32.mrf.mxu0 }
 0x154   : > { %v4836_v16 = vpop.f32.mrf.mxu1 }
 0x155   : > { %v6471_v7 = vadd.f32 %v4886_v45, %v4836_v16  ;;  %v1912_v40 = vpop.f32.mrf.mxu0 }
 0x156   : > { %v1591_v59 = vpop.f32.mrf.mxu1 }
 0x157   : > { %v6473_v43 = vadd.f32 %v1912_v40, %v1591_v59  ;;  %v4889_v23 = vpop.f32.mrf.mxu0 }
 0x158   : > { %v4839_v21 = vpop.f32.mrf.mxu1 }
 0x159   : > { %v6475_v1 = vadd.f32 %v4889_v23, %v4839_v21  ;;  %v1922_v46 = vpop.f32.mrf.mxu0 }
 0x15a   : > { %v1601_v25 = vpop.f32.mrf.mxu1 }
 0x15b   : > { %v6477_v9 = vadd.f32 %v1922_v46, %v1601_v25  ;;  %v4892_v42 = vpop.f32.mrf.mxu0 }
 0x15c   : > { %v4842_v31 = vpop.f32.mrf.mxu1 }
 0x15d   : > { %v6479_v13 = vadd.f32 %v4892_v42, %v4842_v31  ;;  %v1932_v35 = vpop.f32.mrf.mxu0 }
 0x15e   : > { %v1611_v5 = vpop.f32.mrf.mxu1 }
 0x15f   : > { %v6481_v53 = vadd.f32 %v1932_v35, %v1611_v5  ;;  %v4895_v8 = vpop.f32.mrf.mxu0 }
 0x160   : > { %v4845_v10 = vpop.f32.mrf.mxu1 }
 0x161   : > { %v6483_v11 = vadd.f32 %v4895_v8, %v4845_v10  ;;  %v1942_v16 = vpop.f32.mrf.mxu0 }
 0x162   : > { %v1621_v60 = vpop.f32.mrf.mxu1 }
 0x163   : > { %v6485_v45 = vadd.f32 %v1942_v16, %v1621_v60  ;;  %v4898_v40 = vpop.f32.mrf.mxu0 }
 0x164   : > { %v4848_v59 = vpop.f32.mrf.mxu1 }
 0x165   : > { %v6487_v21 = vadd.f32 %v4898_v40, %v4848_v59  ;;  %v1952_v25 = vpop.f32.mrf.mxu0 }
 0x166   : > { %v1631_v23 = vpop.f32.mrf.mxu1 }
 0x167   : > { %v6489_v46 = vadd.f32 %v1952_v25, %v1631_v23  ;;  %v4901_v42 = vpop.f32.mrf.mxu0 }
 0x168   : > { %v4851_v31 = vpop.f32.mrf.mxu1 }
 0x169   : > { %v6491_v5 = vadd.f32 %v4901_v42, %v4851_v31  ;;  %v1962_v62 = vpop.f32.mrf.mxu0 }
 0x16a   : > { %v1641_v35 = vpop.f32.mrf.mxu1 }
 0x16b   : > { %v6493_v10 = vadd.f32 %v1962_v62, %v1641_v35  ;;  %v4904_v14 = vpop.f32.mrf.mxu0 }
 0x16c   : > { %v4854_v8 = vpop.f32.mrf.mxu1 }
 0x16d   : > { %v6495_v60 = vadd.f32 %v4904_v14, %v4854_v8  ;;  %v1972_v20 = vpop.f32.mrf.mxu0 }
 0x16e   : > { %v1651_v16 = vpop.f32.mrf.mxu1 }
 0x16f   : > { %v6497_v59 = vadd.f32 %v1972_v20, %v1651_v16  ;;  %v4907_v38 = vpop.f32.mrf.mxu0 }
 0x170   : > { %v4857_v40 = vpop.f32.mrf.mxu1 }
 0x171   : > { %v6499_v23 = vadd.f32 %v4907_v38, %v4857_v40  ;;  %v1982_v24 = vpop.f32.mrf.mxu0 }
 0x172   : > { %v1661_v25 = vpop.f32.mrf.mxu1 }
 0x173   : > { %7085 = vst [vmem:[#allocation31_spill] sm:$0xff] %v6499_v23  ;;  %v6501_v31 = vadd.f32 %v1982_v24, %v1661_v25  ;;  %v4910_v3 = vpop.f32.mrf.mxu0 }
 0x174   : > { %v4860_v42 = vpop.f32.mrf.mxu1 }
 0x175   : > { %7086 = vst [vmem:[#allocation32_spill] sm:$0xff] %v6501_v31  ;;  %v6503_v62 = vadd.f32 %v4910_v3, %v4860_v42  ;;  %v1992_v17 = vpop.f32.mrf.mxu0 }
 0x176   : > { %v1671_v35 = vpop.f32.mrf.mxu1 }
 0x177   : > { %7087 = vst [vmem:[#allocation10_spill] sm:$0xff] %v6503_v62  ;;  %v6505_v14 = vadd.f32 %v1992_v17, %v1671_v35  ;;  %v4913_v28 = vpop.f32.mrf.mxu0 }
 0x178   : > { %v4863_v8 = vpop.f32.mrf.mxu1 }
 0x179   : > { %v6507_v20 = vadd.f32 %v4913_v28, %v4863_v8  ;;  %v2002_v2 = vpop.f32.mrf.mxu0 }
 0x17a   : > { %v1681_v16 = vpop.f32.mrf.mxu1 }
 0x17b   : > { %v6509_v38 = vadd.f32 %v2002_v2, %v1681_v16  ;;  %v4916_v23 = vpop.f32.mrf.mxu0 }
 0x17c   : > { %v4866_v40 = vpop.f32.mrf.mxu1 }
 0x17d   : > { %v6511_v24 = vadd.f32 %v4916_v23, %v4866_v40  ;;  %v2012_v31 = vpop.f32.mrf.mxu0 }
 0x17e   : > { %v1691_v25 = vpop.f32.mrf.mxu1 }
 0x17f   : > { %v6513_v3 = vadd.f32 %v2012_v31, %v1691_v25  ;;  %v6515_v62 = vpop.f32.mrf.mxu0 }
 0x180   : > { %v4921_v42 = vpop.f32.mrf.mxu1  ;;  %7088 = vst [vmem:[#allocation33_spill] sm:$0xff] %v6515_v62 }
 0x181   : > { %v2377_v17 = vadd.f32 %v4921_v42, %v6451_v19  ;;  %v6518_v28 = vpop.f32.mrf.mxu0 }
 0x182   : > { %v2217_v35 = vpop.f32.mrf.mxu1 }
 0x183   : > { %v6521_v8 = vadd.f32 %v2377_v17, %v6240_v54  ;;  %v2376_v2 = vadd.f32 %v2217_v35, %v6453_v63  ;;  %v6524_v23 = vpop.f32.mrf.mxu0 }
 0x184   : > { %v4924_v16 = vpop.f32.mrf.mxu1 }
 0x185   : > { %v6527_v40 = vadd.f32 %v2376_v2, %v6247_v49  ;;  %v2379_v31 = vadd.f32 %v4924_v16, %v6455_v41  ;;  %v6530_v62 = vpop.f32.mrf.mxu0 }
 0x186   : > { %v2227_v25 = vpop.f32.mrf.mxu1 }
 0x187   : > { %v6533_v19 = vadd.f32 %v2379_v31, %v6254_v4  ;;  %v2378_v42 = vadd.f32 %v2227_v25, %v6457_v27  ;;  %v6536_v17 = vpop.f32.mrf.mxu0 }
 0x188   : > { %v4927_v54 = vpop.f32.mrf.mxu1 }
 0x189   : > { %v6539_v63 = vadd.f32 %v2378_v42, %v6261_v15  ;;  %v2381_v35 = vadd.f32 %v4927_v54, %v6459_v51  ;;  %v6542_v2 = vpop.f32.mrf.mxu0 }
 0x18a   : > { %v2237_v49 = vpop.f32.mrf.mxu1 }
 0x18b   : > { %v6545_v41 = vadd.f32 %v2381_v35, %v6268_v18  ;;  %v2380_v16 = vadd.f32 %v2237_v49, %v6461_v39  ;;  %v6548_v31 = vpop.f32.mrf.mxu0 }
 0x18c   : > { %v4930_v4 = vpop.f32.mrf.mxu1 }
 0x18d   : > { %v6551_v27 = vadd.f32 %v2380_v16, %v6275_v48  ;;  %v2383_v25 = vadd.f32 %v4930_v4, %v6463_v33  ;;  %v6554_v42 = vpop.f32.mrf.mxu0 }
 0x18e   : > { %v2247_v15 = vpop.f32.mrf.mxu1 }
 0x18f   : > { %v6557_v51 = vadd.f32 %v2383_v25, %v6282_v22  ;;  %v2382_v54 = vadd.f32 %v2247_v15, %v6465_v0  ;;  %v6560_v35 = vpop.f32.mrf.mxu0 }
 0x190   : > { %v4933_v18 = vpop.f32.mrf.mxu1 }
 0x191   : > { %v6563_v39 = vadd.f32 %v2382_v54, %v6289_v50  ;;  %v2385_v49 = vadd.f32 %v4933_v18, %v6467_v55  ;;  %v6566_v16 = vpop.f32.mrf.mxu0 }
 0x192   : > { %v2257_v48 = vpop.f32.mrf.mxu1 }
 0x193   : > { %v6569_v33 = vadd.f32 %v2385_v49, %v6296_v26  ;;  %v2384_v4 = vadd.f32 %v2257_v48, %v6469_v36  ;;  %v6572_v25 = vpop.f32.mrf.mxu0 }
 0x194   : > { %v4936_v22 = vpop.f32.mrf.mxu1 }
 0x195   : > { %v6575_v0 = vadd.f32 %v2384_v4, %v6303_v58  ;;  %v2387_v15 = vadd.f32 %v4936_v22, %v6471_v7  ;;  %v6578_v54 = vpop.f32.mrf.mxu0 }
 0x196   : > { %v2267_v50 = vpop.f32.mrf.mxu1 }
 0x197   : > { %v6581_v55 = vadd.f32 %v2387_v15, %v6310_v30  ;;  %v2386_v18 = vadd.f32 %v2267_v50, %v6473_v43  ;;  %v6584_v49 = vpop.f32.mrf.mxu0 }
 0x198   : > { %v4939_v26 = vpop.f32.mrf.mxu1 }
 0x199   : > { %v6587_v36 = vadd.f32 %v2386_v18, %v6317_v29  ;;  %v2389_v48 = vadd.f32 %v4939_v26, %v6475_v1  ;;  %v6590_v4 = vpop.f32.mrf.mxu0 }
 0x19a   : > { %v2277_v58 = vpop.f32.mrf.mxu1 }
 0x19b   : > { %v6593_v7 = vadd.f32 %v2389_v48, %v6324_v34  ;;  %v2388_v22 = vadd.f32 %v2277_v58, %v6477_v9  ;;  %v6596_v15 = vpop.f32.mrf.mxu0 }
 0x19c   : > { %v4942_v30 = vpop.f32.mrf.mxu1 }
 0x19d   : > { %v6599_v43 = vadd.f32 %v2388_v22, %v6331_v44  ;;  %v2391_v50 = vadd.f32 %v4942_v30, %v6479_v13  ;;  %v6602_v18 = vpop.f32.mrf.mxu0 }
 0x19e   : > { %v2287_v29 = vpop.f32.mrf.mxu1 }
 0x19f   : > { %v6605_v1 = vadd.f32 %v2391_v50, %v6338_v32  ;;  %v2390_v26 = vadd.f32 %v2287_v29, %v6481_v53  ;;  %v6608_v48 = vpop.f32.mrf.mxu0 }
 0x1a0   : > { %v4945_v34 = vpop.f32.mrf.mxu1 }
 0x1a1   : > { %v6611_v9 = vadd.f32 %v2390_v26, %v6345_v52  ;;  %v2393_v58 = vadd.f32 %v4945_v34, %v6483_v11  ;;  %v6614_v22 = vpop.f32.mrf.mxu0 }
 0x1a2   : > { %v2297_v44 = vpop.f32.mrf.mxu1 }
 0x1a3   : > { %v6617_v13 = vadd.f32 %v2393_v58, %v6352_v56  ;;  %v2392_v30 = vadd.f32 %v2297_v44, %v6485_v45  ;;  %v6620_v50 = vpop.f32.mrf.mxu0 }
 0x1a4   : > { %v4948_v32 = vpop.f32.mrf.mxu1 }
 0x1a5   : > { %v6623_v53 = vadd.f32 %v2392_v30, %v6359_v6  ;;  %v2395_v29 = vadd.f32 %v4948_v32, %v6487_v21  ;;  %v6626_v26 = vpop.f32.mrf.mxu0 }
 0x1a6   : > { %v2307_v52 = vpop.f32.mrf.mxu1 }
 0x1a7   : > { %v6629_v11 = vadd.f32 %v2395_v29, %v6366_v57  ;;  %v2394_v34 = vadd.f32 %v2307_v52, %v6489_v46  ;;  %v6632_v58 = vpop.f32.mrf.mxu0 }
 0x1a8   : > { %v4951_v56 = vpop.f32.mrf.mxu1 }
 0x1a9   : > { %v6635_v45 = vadd.f32 %v2394_v34, %v6373_v61  ;;  %v2397_v44 = vadd.f32 %v4951_v56, %v6491_v5  ;;  %v6638_v30 = vpop.f32.mrf.mxu0 }
 0x1aa   : > { %v2317_v6 = vpop.f32.mrf.mxu1 }
 0x1ab   : > { %v6641_v21 = vadd.f32 %v2397_v44, %v6380_v47  ;;  %v2396_v32 = vadd.f32 %v2317_v6, %v6493_v10  ;;  %v6644_v29 = vpop.f32.mrf.mxu0  ;;  %v7095_v10 = vld [vmem:[#allocation25_spill] sm:$0xff] }
 0x1ac   : > { %v4954_v57 = vpop.f32.mrf.mxu1  ;;  %7090 = vst [vmem:[#allocation11_spill] sm:$0xff] %v6644_v29  ;;  %v7096_v29 = vld [vmem:[#allocation31_spill] sm:$0xff] }
 0x1ad   : > { %7089 = vst [vmem:[#allocation34_spill] sm:$0xff] %v6641_v21  ;;  %v6647_v46 = vadd.f32 %v2396_v32, %v6387_v37  ;;  %v2399_v52 = vadd.f32 %v4954_v57, %v6495_v60  ;;  %v6650_v34 = vpop.f32.mrf.mxu0  ;;  %v7097_v60 = vld [vmem:[#allocation26_spill] sm:$0xff] }
 0x1ae   : > { %v2327_v61 = vpop.f32.mrf.mxu1  ;;  %7092 = vst [vmem:[#allocation36_spill] sm:$0xff] %v6650_v34  ;;  %v7099_v34 = vld [vmem:[#allocation32_spill] sm:$0xff] }
 0x1af   : > { %7091 = vst [vmem:[#allocation35_spill] sm:$0xff] %v6647_v46  ;;  %v6653_v5 = vadd.f32 %v2399_v52, %v6396_v12  ;;  %v2398_v56 = vadd.f32 %v2327_v61, %v6497_v59  ;;  %v6656_v44 = vpop.f32.mrf.mxu0  ;;  %v7100_v59 = vld [vmem:[#allocation27_spill] sm:$0xff] }
 0x1b0   : > { %v4957_v47 = vpop.f32.mrf.mxu1  ;;  %7094 = vst [vmem:[#allocation37_spill] sm:$0xff] %v6656_v44  ;;  %v7102_v44 = vld [vmem:[#allocation10_spill] sm:$0xff] }
 0x1b1   : > { %7093 = vst [vmem:[#allocation12_spill] sm:$0xff] %v6653_v5  ;;  %v6659_v6 = vadd.f32 %v2398_v56, %v7095_v10  ;;  %v2401_v21 = vadd.f32 %v4957_v47, %v7096_v29  ;;  %v6662_v32 = vpop.f32.mrf.mxu0  ;;  %v7103_v29 = vld [vmem:[#allocation28_spill] sm:$0xff] }
 0x1b2   : > { %v2337_v37 = vpop.f32.mrf.mxu1 }
 0x1b3   : > { %v6665_v57 = vadd.f32 %v2401_v21, %v7097_v60  ;;  %v2400_v46 = vadd.f32 %v2337_v37, %v7099_v34  ;;  %v6668_v52 = vpop.f32.mrf.mxu0  ;;  %v7106_v34 = vld [vmem:[#allocation29_spill] sm:$0xff] }
 0x1b4   : > { %v4960_v12 = vpop.f32.mrf.mxu1 }
 0x1b5   : > { %7098 = vst [vmem:[#allocation38_spill] sm:$0xff] %v6665_v57  ;;  %v6671_v61 = vadd.f32 %v2400_v46, %v7100_v59  ;;  %v2403_v5 = vadd.f32 %v4960_v12, %v7102_v44  ;;  %v6674_v10 = vpop.f32.mrf.mxu0  ;;  %v7108_v44 = vld [vmem:[#allocation43_spill] sm:$0xff] }
 0x1b6   : > { %v2347_v56 = vpop.f32.mrf.mxu1 }
 0x1b7   : > { %7101 = vst [vmem:[#allocation13_spill] sm:$0xff] %v6671_v61  ;;  %v6677_v47 = vadd.f32 %v2403_v5, %v7103_v29  ;;  %v2402_v21 = vadd.f32 %v2347_v56, %v6505_v14  ;;  %v6680_v57 = vpop.f32.mrf.mxu0  ;;  %v7111_v14 = vld [vmem:[#allocation44_spill] sm:$0xff] }
 0x1b8   : > { %v4963_v60 = vpop.f32.mrf.mxu1  ;;  %7105 = vst [vmem:[#allocation40_spill] sm:$0xff] %v6680_v57 }
 0x1b9   : > { %7104 = vst [vmem:[#allocation39_spill] sm:$0xff] %v6677_v47  ;;  %v6683_v37 = vadd.f32 %v2402_v21, %v7106_v34  ;;  %v2405_v46 = vadd.f32 %v4963_v60, %v6507_v20  ;;  %v6686_v61 = vpop.f32.mrf.mxu0  ;;  %v7114_v20 = vld [vmem:[#allocation30_spill] sm:$0xff] }
 0x1ba   : > { %v2357_v59 = vpop.f32.mrf.mxu1  ;;  %7107 = vst [vmem:[#allocation14_spill] sm:$0xff] %v6686_v61 }
 0x1bb   : > { %v6689_v12 = vadd.f32 %v2405_v46, %v7108_v44  ;;  %v2404_v5 = vadd.f32 %v2357_v59, %v6509_v38  ;;  %v6692_v47 = vpop.f32.mrf.mxu0  ;;  %v7116_v44 = vld [vmem:[#allocation9_spill] sm:$0xff] }
 0x1bc   : > { %v4966_v29 = vpop.f32.mrf.mxu1  ;;  %7110 = vst [vmem:[#allocation42_spill] sm:$0xff] %v6692_v47 }
 0x1bd   : > { %7109 = vst [vmem:[#allocation41_spill] sm:$0xff] %v6689_v12  ;;  %v6695_v56 = vadd.f32 %v2404_v5, %v7111_v14  ;;  %v2407_v57 = vadd.f32 %v4966_v29, %v6511_v24  ;;  %v6698_v34 = vpop.f32.mrf.mxu0  ;;  %v7117_v5 = vld [vmem:[#allocation33_spill] sm:$0xff] }
 0x1be   : > { %v2367_v21 = vpop.f32.mrf.mxu1  ;;  %7113 = vst [vmem:[#allocation16_spill] sm:$0xff] %v6698_v34 }
 0x1bf   : > { %7112 = vst [vmem:[#allocation15_spill] sm:$0xff] %v6695_v56  ;;  %v6704_v60 = vadd.f32 %v2407_v57, %v7114_v20  ;;  %v2406_v46 = vadd.f32 %v2367_v21, %v6513_v3  ;;  %v5071_v59 = vpop.f32.mrf.mxu0 }
 0x1c0   : > { %v5021_v38 = vpop.f32.mrf.mxu1 }
 0x1c1   : > { %7115 = vst [vmem:[#allocation17_spill] sm:$0xff] %v6704_v60  ;;  %v6708_v47 = vadd.f32 %v2406_v46, %v7116_v44  ;;  %v2998_v14 = vadd.f32 %v5021_v38, %v7117_v5  ;;  %v3347_v29 = vpop.f32.mrf.mxu0 }
 0x1c2   : > { %v2992_v24 = vpop.f32.mrf.mxu1 }
 0x1c3   : > { %v3507_v56 = vadd.f32 %v5071_v59, %v2998_v14  ;;  %v2993_v34 = vadd.f32 %v2992_v24, %v6518_v28  ;;  %v5074_v61 = vpop.f32.mrf.mxu0 }
 0x1c4   : > { %v5024_v12 = vpop.f32.mrf.mxu1 }
 0x1c5   : > { %v3539_v57 = vadd.f32 %v3507_v56, %v6521_v8  ;;  %v3506_v20 = vadd.f32 %v3347_v29, %v2993_v34  ;;  %v3008_v3 = vadd.f32 %v5024_v12, %v6524_v23  ;;  %v3357_v60 = vpop.f32.mrf.mxu0 }
 0x1c6   : > { %v3002_v21 = vpop.f32.mrf.mxu1 }
 0x1c7   : > { %3571 = vst [vmem:[%s6715_s7 + $0x8] sm:$0xff] %v3539_v57  ;;  %v3538_v46 = vadd.f32 %v3506_v20, %v6527_v40  ;;  %v3509_v38 = vadd.f32 %v5074_v61, %v3008_v3  ;;  %v3003_v28 = vadd.f32 %v3002_v21, %v6530_v62  ;;  %v3640_v59 = vmul.f32 %v3539_v57, %v3539_v57  ;;  %v5077_v5 = vpop.f32.mrf.mxu0 }
 0x1c8   : > { %v5027_v44 = vpop.f32.mrf.mxu1 }
 0x1c9   : > { %3570 = vst [vmem:[%s6715_s7] sm:$0xff] %v3538_v46  ;;  %v3602_v8 = vadd.f32 %v3539_v57, %v3538_v46  ;;  %v3639_v23 = vmul.f32 %v3538_v46, %v3538_v46  ;;  %v3541_v12 = vadd.f32 %v3509_v38, %v6533_v19  ;;  %v3508_v56 = vadd.f32 %v3357_v60, %v3003_v28  ;;  %v3367_v24 = vpop.f32.mrf.mxu0 }
 0x1ca   : > { %v3018_v34 = vadd.f32 %v5027_v44, %v6536_v17  ;;  %v3012_v14 = vpop.f32.mrf.mxu1 }
 0x1cb   : > { %v3671_v29 = vadd.f32 %v3640_v59, %v3639_v23  ;;  %3573 = vst [vmem:[%s6715_s7 + $0x18] sm:$0xff] %v3541_v12  ;;  %v3540_v40 = vadd.f32 %v3508_v56, %v6539_v63  ;;  %v3013_v62 = vadd.f32 %v3012_v14, %v6542_v2  ;;  %v5080_v3 = vpop.f32.mrf.mxu0  ;;  %v3642_v17 = vmul.f32 %v3541_v12, %v3541_v12 }
 0x1cc   : > { %v3511_v61 = vadd.f32 %v5077_v5, %v3018_v34  ;;  %v5030_v20 = vpop.f32.mrf.mxu1 }
 0x1cd   : > { %3572 = vst [vmem:[%s6715_s7 + $0x10] sm:$0xff] %v3540_v40  ;;  %v3603_v57 = vadd.f32 %v3602_v8, %v3540_v40  ;;  %v3641_v21 = vmul.f32 %v3540_v40, %v3540_v40  ;;  %v3510_v19 = vadd.f32 %v3367_v24, %v3013_v62  ;;  %v3028_v60 = vadd.f32 %v5030_v20, %v6548_v31  ;;  %v3377_v28 = vpop.f32.mrf.mxu0 }
 0x1ce   : > { %v3543_v46 = vadd.f32 %v3511_v61, %v6545_v41  ;;  %v3022_v38 = vpop.f32.mrf.mxu1 }
 0x1cf   : > { %v3672_v59 = vadd.f32 %v3671_v29, %v3641_v21  ;;  %v3542_v63 = vadd.f32 %v3510_v19, %v6551_v27  ;;  %v3604_v2 = vadd.f32 %v3603_v57, %v3541_v12  ;;  %v3513_v44 = vadd.f32 %v5080_v3, %v3028_v60  ;;  %v5083_v23 = vpop.f32.mrf.mxu0 }
 0x1d0   : > { %3575 = vst [vmem:[%s6715_s7 + $0x28] sm:$0xff] %v3543_v46  ;;  %v3023_v5 = vadd.f32 %v3022_v38, %v6554_v42  ;;  %v5033_v8 = vpop.f32.mrf.mxu1  ;;  %v3644_v12 = vmul.f32 %v3543_v46, %v3543_v46 }
 0x1d1   : > { %3574 = vst [vmem:[%s6715_s7 + $0x20] sm:$0xff] %v3542_v63  ;;  %v3605_v56 = vadd.f32 %v3604_v2, %v3542_v63  ;;  %v3643_v34 = vmul.f32 %v3542_v63, %v3542_v63  ;;  %v3673_v31 = vadd.f32 %v3672_v59, %v3642_v17  ;;  %v3545_v14 = vadd.f32 %v3513_v44, %v6557_v51  ;;  %v3387_v27 = vpop.f32.mrf.mxu0 }
 0x1d2   : > { %v3512_v41 = vadd.f32 %v3377_v28, %v3023_v5  ;;  %v3038_v24 = vadd.f32 %v5033_v8, %v6560_v35  ;;  %v3032_v29 = vpop.f32.mrf.mxu1 }
 0x1d3   : > { %v3674_v40 = vadd.f32 %v3673_v31, %v3643_v34  ;;  %3577 = vst [vmem:[%s6715_s7 + $0x38] sm:$0xff] %v3545_v14  ;;  %v3606_v62 = vadd.f32 %v3605_v56, %v3543_v46  ;;  %v3033_v42 = vadd.f32 %v3032_v29, %v6566_v16  ;;  %v5086_v57 = vpop.f32.mrf.mxu0  ;;  %v3646_v59 = vmul.f32 %v3545_v14, %v3545_v14 }
 0x1d4   : > { %v3544_v61 = vadd.f32 %v3512_v41, %v6563_v39  ;;  %v3515_v20 = vadd.f32 %v5083_v23, %v3038_v24  ;;  %v5036_v3 = vpop.f32.mrf.mxu1 }
 0x1d5   : > { %v3675_v21 = vadd.f32 %v3674_v40, %v3644_v12  ;;  %v3514_v51 = vadd.f32 %v3387_v27, %v3033_v42  ;;  %v3048_v19 = vadd.f32 %v5036_v3, %v6572_v25  ;;  %v3397_v46 = vpop.f32.mrf.mxu0 }
 0x1d6   : > { %3576 = vst [vmem:[%s6715_s7 + $0x30] sm:$0xff] %v3544_v61  ;;  %v3607_v35 = vadd.f32 %v3606_v62, %v3544_v61  ;;  %v3645_v60 = vmul.f32 %v3544_v61, %v3544_v61  ;;  %v3547_v17 = vadd.f32 %v3515_v20, %v6569_v33  ;;  %v3042_v38 = vpop.f32.mrf.mxu1 }
 0x1d7   : > { %v3546_v16 = vadd.f32 %v3514_v51, %v6575_v0  ;;  %v3517_v28 = vadd.f32 %v5086_v57, %v3048_v19  ;;  %v3043_v39 = vadd.f32 %v3042_v38, %v6578_v54  ;;  %v5089_v25 = vpop.f32.mrf.mxu0 }
 0x1d8   : > { %v3676_v63 = vadd.f32 %v3675_v21, %v3645_v60  ;;  %3579 = vst [vmem:[%s6715_s7 + $0x48] sm:$0xff] %v3547_v17  ;;  %v3608_v2 = vadd.f32 %v3607_v35, %v3545_v14  ;;  %v5039_v44 = vpop.f32.mrf.mxu1  ;;  %v3648_v24 = vmul.f32 %v3547_v17, %v3547_v17 }
 0x1d9   : > { %3578 = vst [vmem:[%s6715_s7 + $0x40] sm:$0xff] %v3546_v16  ;;  %v3647_v5 = vmul.f32 %v3546_v16, %v3546_v16  ;;  %v3549_v8 = vadd.f32 %v3517_v28, %v6581_v55  ;;  %v3516_v33 = vadd.f32 %v3397_v46, %v3043_v39  ;;  %v3058_v23 = vadd.f32 %v5039_v44, %v6584_v49  ;;  %v3407_v31 = vpop.f32.mrf.mxu0 }
 0x1da   : > { %v3609_v56 = vadd.f32 %v3608_v2, %v3546_v16  ;;  %v3677_v0 = vadd.f32 %v3676_v63, %v3646_v59  ;;  %v3052_v34 = vpop.f32.mrf.mxu1 }
 0x1db   : > { %3581 = vst [vmem:[%s6715_s7 + $0x58] sm:$0xff] %v3549_v8  ;;  %v3548_v54 = vadd.f32 %v3516_v33, %v6587_v36  ;;  %v3519_v41 = vadd.f32 %v5089_v25, %v3058_v23  ;;  %v3053_v14 = vadd.f32 %v3052_v34, %v6590_v4  ;;  %v5092_v55 = vpop.f32.mrf.mxu0  ;;  %v3650_v51 = vmul.f32 %v3549_v8, %v3549_v8 }
 0x1dc   : > { %v3678_v29 = vadd.f32 %v3677_v0, %v3647_v5  ;;  %v3610_v27 = vadd.f32 %v3609_v56, %v3547_v17  ;;  %v5042_v12 = vpop.f32.mrf.mxu1 }
 0x1dd   : > { %3580 = vst [vmem:[%s6715_s7 + $0x50] sm:$0xff] %v3548_v54  ;;  %v3649_v40 = vmul.f32 %v3548_v54, %v3548_v54  ;;  %v3551_v49 = vadd.f32 %v3519_v41, %v6593_v7  ;;  %v3518_v62 = vadd.f32 %v3407_v31, %v3053_v14  ;;  %v3068_v42 = vadd.f32 %v5042_v12, %v6596_v15  ;;  %v3417_v3 = vpop.f32.mrf.mxu0 }
 0x1de   : > { %v3611_v61 = vadd.f32 %v3610_v27, %v3548_v54  ;;  %v3679_v20 = vadd.f32 %v3678_v29, %v3648_v24  ;;  %v3062_v36 = vpop.f32.mrf.mxu1 }
 0x1df   : > { %3583 = vst [vmem:[%s6715_s7 + $0x68] sm:$0xff] %v3551_v49  ;;  %v3550_v4 = vadd.f32 %v3518_v62, %v6599_v43  ;;  %v3521_v57 = vadd.f32 %v5092_v55, %v3068_v42  ;;  %v3063_v21 = vadd.f32 %v3062_v36, %v6602_v18  ;;  %v5095_v7 = vpop.f32.mrf.mxu0  ;;  %v3652_v2 = vmul.f32 %v3551_v49, %v3551_v49 }
 0x1e0   : > { %v3680_v19 = vadd.f32 %v3679_v20, %v3649_v40  ;;  %v3612_v35 = vadd.f32 %v3611_v61, %v3549_v8  ;;  %v5045_v60 = vpop.f32.mrf.mxu1 }
 0x1e1   : > { %3582 = vst [vmem:[%s6715_s7 + $0x60] sm:$0xff] %v3550_v4  ;;  %v3651_v17 = vmul.f32 %v3550_v4, %v3550_v4  ;;  %v3553_v15 = vadd.f32 %v3521_v57, %v6605_v1  ;;  %v3520_v38 = vadd.f32 %v3417_v3, %v3063_v21  ;;  %v3078_v46 = vadd.f32 %v5045_v60, %v6608_v48  ;;  %v3427_v39 = vpop.f32.mrf.mxu0  ;;  %v7118_v21 = vld [vmem:[#allocation34_spill] sm:$0xff] }
 0x1e2   : > { %v3613_v16 = vadd.f32 %v3612_v35, %v3550_v4  ;;  %v3681_v28 = vadd.f32 %v3680_v19, %v3650_v51  ;;  %v3072_v43 = vpop.f32.mrf.mxu1  ;;  %v7119_v19 = vld [vmem:[#allocation11_spill] sm:$0xff] }
 0x1e3   : > { %3585 = vst [vmem:[%s6715_s7 + $0x78] sm:$0xff] %v3553_v15  ;;  %v3552_v18 = vadd.f32 %v3520_v38, %v6611_v9  ;;  %v3523_v59 = vadd.f32 %v5095_v7, %v3078_v46  ;;  %v3073_v63 = vadd.f32 %v3072_v43, %v6614_v22  ;;  %v5098_v1 = vpop.f32.mrf.mxu0  ;;  %v3654_v41 = vmul.f32 %v3553_v15, %v3553_v15  ;;  %v7121_v46 = vld [vmem:[#allocation36_spill] sm:$0xff] }
 0x1e4   : > { %v3682_v44 = vadd.f32 %v3681_v28, %v3651_v17  ;;  %v3614_v25 = vadd.f32 %v3613_v16, %v3551_v49  ;;  %v5048_v5 = vpop.f32.mrf.mxu1 }
 0x1e5   : > { %3584 = vst [vmem:[%s6715_s7 + $0x70] sm:$0xff] %v3552_v18  ;;  %v3653_v8 = vmul.f32 %v3552_v18, %v3552_v18  ;;  %v3555_v48 = vadd.f32 %v3523_v59, %v6617_v13  ;;  %v3522_v33 = vadd.f32 %v3427_v39, %v3073_v63  ;;  %v3088_v23 = vadd.f32 %v5048_v5, %v6620_v50  ;;  %v3437_v34 = vpop.f32.mrf.mxu0  ;;  %v7123_v5 = vld [vmem:[#allocation37_spill] sm:$0xff] }
 0x1e6   : > { %v3615_v56 = vadd.f32 %v3614_v25, %v3552_v18  ;;  %v3683_v0 = vadd.f32 %v3682_v44, %v3652_v2  ;;  %v3082_v9 = vpop.f32.mrf.mxu1  ;;  %v7122_v2 = vld [vmem:[#allocation12_spill] sm:$0xff] }
 0x1e7   : > { %3587 = vst [vmem:[%s6715_s7 + $0x88] sm:$0xff] %v3555_v48  ;;  %v3554_v22 = vadd.f32 %v3522_v33, %v6623_v53  ;;  %v3525_v31 = vadd.f32 %v5098_v1, %v3088_v23  ;;  %v3083_v54 = vadd.f32 %v3082_v9, %v6626_v26  ;;  %v5101_v13 = vpop.f32.mrf.mxu0  ;;  %v3656_v20 = vmul.f32 %v3555_v48, %v3555_v48 }
 0x1e8   : > { %v3684_v14 = vadd.f32 %v3683_v0, %v3653_v8  ;;  %v3616_v24 = vadd.f32 %v3615_v56, %v3553_v15  ;;  %v5051_v29 = vpop.f32.mrf.mxu1  ;;  %v7120_v15 = vld [vmem:[#allocation35_spill] sm:$0xff] }
 0x1e9   : > { %3586 = vst [vmem:[%s6715_s7 + $0x80] sm:$0xff] %v3554_v22  ;;  %v3655_v27 = vmul.f32 %v3554_v22, %v3554_v22  ;;  %v3557_v50 = vadd.f32 %v3525_v31, %v6629_v11  ;;  %v3524_v12 = vadd.f32 %v3437_v34, %v3083_v54  ;;  %v3098_v55 = vadd.f32 %v5051_v29, %v6632_v58  ;;  %v3447_v62 = vpop.f32.mrf.mxu0 }
 0x1ea   : > { %v3617_v40 = vadd.f32 %v3616_v24, %v3554_v22  ;;  %v3685_v49 = vadd.f32 %v3684_v14, %v3654_v41  ;;  %v3092_v53 = vpop.f32.mrf.mxu1  ;;  %v7124_v24 = vld [vmem:[#allocation38_spill] sm:$0xff] }
 0x1eb   : > { %3589 = vst [vmem:[%s6715_s7 + $0x98] sm:$0xff] %v3557_v50  ;;  %v3556_v26 = vadd.f32 %v3524_v12, %v6635_v45  ;;  %v3527_v42 = vadd.f32 %v5101_v13, %v3098_v55  ;;  %v3093_v61 = vadd.f32 %v3092_v53, %v6638_v30  ;;  %v5104_v11 = vpop.f32.mrf.mxu0  ;;  %v3658_v28 = vmul.f32 %v3557_v50, %v3557_v50 }
 0x1ec   : > { %v3686_v36 = vadd.f32 %v3685_v49, %v3655_v27  ;;  %v3618_v3 = vadd.f32 %v3617_v40, %v3555_v48  ;;  %v5054_v4 = vpop.f32.mrf.mxu1  ;;  %v7125_v40 = vld [vmem:[#allocation13_spill] sm:$0xff] }
 0x1ed   : > { %3588 = vst [vmem:[%s6715_s7 + $0x90] sm:$0xff] %v3556_v26  ;;  %v3657_v57 = vmul.f32 %v3556_v26, %v3556_v26  ;;  %v3559_v58 = vadd.f32 %v3527_v42, %v7118_v21  ;;  %v3526_v51 = vadd.f32 %v3447_v62, %v3093_v61  ;;  %v3108_v35 = vadd.f32 %v5054_v4, %v7119_v19  ;;  %v3457_v17 = vpop.f32.mrf.mxu0 }
 0x1ee   : > { %v3619_v60 = vadd.f32 %v3618_v3, %v3556_v26  ;;  %v3687_v7 = vadd.f32 %v3686_v36, %v3656_v20  ;;  %v3102_v45 = vpop.f32.mrf.mxu1  ;;  %v7126_v3 = vld [vmem:[#allocation39_spill] sm:$0xff] }
 0x1ef   : > { %3591 = vst [vmem:[%s6715_s7 + $0xa8] sm:$0xff] %v3559_v58  ;;  %v3558_v30 = vadd.f32 %v3526_v51, %v7120_v15  ;;  %v3529_v38 = vadd.f32 %v5104_v11, %v3108_v35  ;;  %v3103_v16 = vadd.f32 %v3102_v45, %v7121_v46  ;;  %v5107_v59 = vpop.f32.mrf.mxu0  ;;  %v3660_v34 = vmul.f32 %v3559_v58, %v3559_v58  ;;  %v7127_v11 = vld [vmem:[#allocation40_spill] sm:$0xff] }
 0x1f0   : > { %v3688_v43 = vadd.f32 %v3687_v7, %v3657_v57  ;;  %v3620_v39 = vadd.f32 %v3619_v60, %v3557_v50  ;;  %v5057_v18 = vpop.f32.mrf.mxu1  ;;  %v7128_v60 = vld [vmem:[#allocation14_spill] sm:$0xff] }
 0x1f1   : > { %3590 = vst [vmem:[%s6715_s7 + $0xa0] sm:$0xff] %v3558_v30  ;;  %v3659_v63 = vmul.f32 %v3558_v30, %v3558_v30  ;;  %v3561_v44 = vadd.f32 %v3529_v38, %v7122_v2  ;;  %v3528_v25 = vadd.f32 %v3457_v17, %v3103_v16  ;;  %v3118_v1 = vadd.f32 %v5057_v18, %v7123_v5  ;;  %v3467_v23 = vpop.f32.mrf.mxu0  ;;  %v7129_v16 = vld [vmem:[#allocation41_spill] sm:$0xff]  ;;  %v7131_v2 = vld [vmem:[#allocation15_spill] sm:$0xff]  ;;  %v7132_v5 = vld [vmem:[#allocation16_spill] sm:$0xff] }
 0x1f2   : > { %v3621_v8 = vadd.f32 %v3620_v39, %v3558_v30  ;;  %v3689_v48 = vadd.f32 %v3688_v43, %v3658_v28  ;;  %v3112_v33 = vpop.f32.mrf.mxu1  ;;  %v7130_v39 = vld [vmem:[#allocation42_spill] sm:$0xff] }
 0x1f3   : > { %3593 = vst [vmem:[%s6715_s7 + $0xb8] sm:$0xff] %v3561_v44  ;;  %v3560_v56 = vadd.f32 %v3528_v25, %v6659_v6  ;;  %v3531_v0 = vadd.f32 %v5107_v59, %v3118_v1  ;;  %v3113_v9 = vadd.f32 %v3112_v33, %v6662_v32  ;;  %v5110_v41 = vpop.f32.mrf.mxu0  ;;  %v3662_v62 = vmul.f32 %v3561_v44, %v3561_v44 }
 0x1f4   : > { %v3690_v22 = vadd.f32 %v3689_v48, %v3659_v63  ;;  %v3622_v31 = vadd.f32 %v3621_v8, %v3559_v58  ;;  %v5060_v54 = vpop.f32.mrf.mxu1 }
 0x1f5   : > { %3592 = vst [vmem:[%s6715_s7 + $0xb0] sm:$0xff] %v3560_v56  ;;  %v3661_v14 = vmul.f32 %v3560_v56, %v3560_v56  ;;  %v3563_v29 = vadd.f32 %v3531_v0, %v7124_v24  ;;  %v3530_v13 = vadd.f32 %v3467_v23, %v3113_v9  ;;  %v3128_v27 = vadd.f32 %v5060_v54, %v6668_v52  ;;  %v3477_v55 = vpop.f32.mrf.mxu0  ;;  %v7133_v0 = vld [vmem:[#allocation17_spill] sm:$0xff] }
 0x1f6   : > { %v3623_v50 = vadd.f32 %v3622_v31, %v3560_v56  ;;  %v3691_v12 = vadd.f32 %v3690_v22, %v3660_v34  ;;  %v3122_v6 = vpop.f32.mrf.mxu1 }
 0x1f7   : > { %3595 = vst [vmem:[%s6715_s7 + $0xc8] sm:$0xff] %v3563_v29  ;;  %v3562_v32 = vadd.f32 %v3530_v13, %v7125_v40  ;;  %v3533_v49 = vadd.f32 %v5110_v41, %v3128_v27  ;;  %v3123_v53 = vadd.f32 %v3122_v6, %v6674_v10  ;;  %v5113_v20 = vpop.f32.mrf.mxu0  ;;  %v3664_v45 = vmul.f32 %v3563_v29, %v3563_v29 }
 0x1f8   : > { %v3692_v26 = vadd.f32 %v3691_v12, %v3661_v14  ;;  %v3624_v42 = vadd.f32 %v3623_v50, %v3561_v44  ;;  %v5063_v61 = vpop.f32.mrf.mxu1 }
 0x1f9   : > { %3594 = vst [vmem:[%s6715_s7 + $0xc0] sm:$0xff] %v3562_v32  ;;  %v3663_v36 = vmul.f32 %v3562_v32, %v3562_v32  ;;  %v3565_v52 = vadd.f32 %v3533_v49, %v7126_v3  ;;  %v3532_v4 = vadd.f32 %v3477_v55, %v3123_v53  ;;  %v3138_v57 = vadd.f32 %v5063_v61, %v7127_v11  ;;  %v3487_v19 = vpop.f32.mrf.mxu0 }
 0x1fa   : > { %v3625_v21 = vadd.f32 %v3624_v42, %v3562_v32  ;;  %v3693_v58 = vadd.f32 %v3692_v26, %v3662_v62  ;;  %v3132_v51 = vpop.f32.mrf.mxu1 }
 0x1fb   : > { %3597 = vst [vmem:[%s6715_s7 + $0xd8] sm:$0xff] %v3565_v52  ;;  %v3564_v10 = vadd.f32 %v3532_v4, %v6683_v37  ;;  %v3535_v35 = vadd.f32 %v5113_v20, %v3138_v57  ;;  %v3133_v7 = vadd.f32 %v3132_v51, %v7128_v60  ;;  %v5116_v38 = vpop.f32.mrf.mxu0  ;;  %v3666_v8 = vmul.f32 %v3565_v52, %v3565_v52 }
 0x1fc   : > { %v3694_v17 = vadd.f32 %v3693_v58, %v3663_v36  ;;  %v3626_v15 = vadd.f32 %v3625_v21, %v3563_v29  ;;  %v5066_v30 = vpop.f32.mrf.mxu1 }
 0x1fd   : > { %3596 = vst [vmem:[%s6715_s7 + $0xd0] sm:$0xff] %v3564_v10  ;;  %v3665_v46 = vmul.f32 %v3564_v10, %v3564_v10  ;;  %v3567_v28 = vadd.f32 %v3535_v35, %v7129_v16  ;;  %v3534_v43 = vadd.f32 %v3487_v19, %v3133_v7  ;;  %v3148_v18 = vadd.f32 %v5066_v30, %v7130_v39  ;;  %v3497_v23 = vpop.f32.mrf.mxu0 }
 0x1fe   : > { %v3627_v37 = vadd.f32 %v3626_v15, %v3564_v10  ;;  %v3695_v59 = vadd.f32 %v3694_v17, %v3664_v45  ;;  %v3142_v63 = vpop.f32.mrf.mxu1 }
 0x1ff   : > { %3599 = vst [vmem:[%s6715_s7 + $0xe8] sm:$0xff] %v3567_v28  ;;  %v3566_v44 = vadd.f32 %v3534_v43, %v7131_v2  ;;  %v3537_v25 = vadd.f32 %v5116_v38, %v3148_v18  ;;  %v3143_v1 = vadd.f32 %v3142_v63, %v7132_v5  ;;  %v3668_v41 = vmul.f32 %v3567_v28, %v3567_v28 }
 0x200   : > { %v3696_v48 = vadd.f32 %v3695_v59, %v3665_v46  ;;  %v3628_v33 = vadd.f32 %v3627_v37, %v3565_v52 }
 0x201   : > { %3598 = vst [vmem:[%s6715_s7 + $0xe0] sm:$0xff] %v3566_v44  ;;  %v3667_v56 = vmul.f32 %v3566_v44, %v3566_v44  ;;  %v3569_v9 = vadd.f32 %v3537_v25, %v7133_v0  ;;  %v3536_v34 = vadd.f32 %v3497_v23, %v3143_v1 }
 0x202   : > { %v3629_v22 = vadd.f32 %v3628_v33, %v3566_v44  ;;  %v3697_v31 = vadd.f32 %v3696_v48, %v3666_v8 }
 0x203   : > { %3601 = vst [vmem:[%s6715_s7 + $0xf8] sm:$0xff] %v3569_v9  ;;  %v3568_v54 = vadd.f32 %v3536_v34, %v6708_v47 }
 0x204   : > { %v3698_v14 = vadd.f32 %v3697_v31, %v3667_v56  ;;  %v3630_v24 = vadd.f32 %v3629_v22, %v3567_v28 }
 0x205   : > { %3600 = vst [vmem:[%s6715_s7 + $0xf0] sm:$0xff] %v3568_v54  ;;  %v3669_v29 = vmul.f32 %v3568_v54, %v3568_v54 }
 0x206   : > { %v3631_v13 = vadd.f32 %v3630_v24, %v3568_v54  ;;  %v3699_v27 = vadd.f32 %v3698_v14, %v3668_v41 }
 0x207   : > { %5195 = shalt.err (!%p5192_p5)
}
 0x208   : > { %s5196_s28 = scalar_lea.hbm %s6811_s18, 4096  ;;  %s5200_s4 = scalar_lea.hbm %s6889_s2, 8192 }
 0x209   : > { %p5197_p6 = scmp.ne.s32.totalorder %s6811_s18, %s5196_s28  ;;  %p5201_p10 = scmp.lt.s32.totalorder %s6811_s18, %s6889_s2 }
 0x20a   : > { %p5202_p11 = scmp.lt.s32.totalorder %s5200_s4, %s5196_s28 }
 0x20b   : > { %p5198_p7 = pnand %p5197_p6, %p5354_p4 }
 0x20c   : > { %p5203_p12 = por %p5202_p11, %p5201_p10 }
 0x20d   : > { %p5199_p9 = pneg %p5198_p7 }
 0x20f   : > { %p5204_p13 = pnand %p5203_p12, %p5199_p9 }
 0x211   : > { %5207 = shalt.err (!%p5204_p13)
}
 0x212   : > { %s5291_s8 = smov 128   ;;  %s5292_s10 = smov 8   ;;  %v3670_v47 = vmul.f32 %v3569_v9, %v3569_v9  ;;  %v3632_v50 = vadd.f32 %v3631_v13, %v3569_v9  ;;  %v3700_v12 = vadd.f32 %v3699_v27, %v3669_v29  ;;  %vm3708_vm1 = vcmask 1040384  }
 0x213   : > { %5120 = dma.vmem_to_hbm [thread:$0]  (%p5354_p4), %s6813_s9, 4096, %s6811_s18, %s3712_s19, %s5291_s8, %s5291_s8, %s5292_s10  }
 0x214   : > { %v3633_v6 = vrot.slane %v3632_v50, 4  ;;  %v3701_v55 = vadd.f32 %v3700_v12, %v3670_v47  ;;  %s3872_s11 = sshll.u32 %s6701_s5, 1  ;;  %s4366_s21 = sshll.u32 %s5280_s15, 5 }
 0x215   : > { %s203_s9 = scalar_lea.vmem [#allocation4], %s3872_s11  ;;  %s6846_s26 = scalar_lea.hbm %s6890_s3, %s4366_s21 }
 0x216   : > { %v3634_v40 = vadd.f32 %v3633_v6, %v3632_v50  ;;  %v3702_v32 = vrot.slane %v3701_v55, 4  ;;  %s3748_s18 = sshll.u32 %s203_s9, 4  ;;  %s3717_s27 = scalar_lea.sflag [#allocation5], %s6701_s5  ;;  %s3749_s18 = int_to_ptr.vmem [resolvable:$true] %s3748_s18 }
 0x217   : > { %s5208_s28 = scalar_lea.vmem %s3749_s18, 32  ;;  %s5293_s15 = smov [#allocation4]  }
 0x218   : > { %v3635_v49 = vrot.slane %v3634_v40, 2  ;;  %v3703_v53 = vadd.f32 %v3702_v32, %v3701_v55  ;;  %p5209_p0 = scmp.ne.s32.totalorder %s3749_s18, %s5208_s28  ;;  %s5212_s29 = sshll.u32 %s5293_s15, 4  ;;  %s5213_s29 = int_to_ptr.vmem [resolvable:$false] %s5212_s29 }
 0x219   : > { %s5214_s30 = scalar_lea.vmem %s5213_s29, 64  ;;  %p5215_p3 = scmp.lt.s32.totalorder %s3749_s18, %s5213_s29 }
 0x21a   : > { %v3636_v62 = vadd.f32 %v3635_v49, %v3634_v40  ;;  %v3704_v26 = vrot.slane %v3703_v53, 2  ;;  %p5210_p1 = pnand %p5209_p0, %p5354_p4  ;;  %p5216_p5 = scmp.lt.s32.totalorder %s5214_s30, %s5208_s28 }
 0x21c   : > { %v3637_v42 = vrot.slane %v3636_v62, 1  ;;  %v3705_v61 = vadd.f32 %v3704_v26, %v3703_v53  ;;  %p5211_p2 = pneg %p5210_p1  ;;  %p5217_p6 = por %p5216_p5, %p5215_p3 }
 0x21e   : > { %v3706_v20 = vrot.slane %v3705_v61, 1  ;;  %v3638_v36 = vadd.f32 %v3637_v42, %v3636_v62  ;;  %p5218_p7 = pnand %p5217_p6, %p5211_p2 }
 0x220   : > { %v3707_v3 = vadd.f32 %v3706_v20, %v3705_v61 }
 0x222   : > { %v3709_v52 = vsel %vm3708_vm1, %v3638_v36, %v3707_v3 }
 0x223   : > { %3710 = vst [vmem:[%s203_s9] sm:$0x3] %v3709_v52 }
 0x224   : > { %5221 = shalt.err (!%p5218_p7)
}
 0x225   : > { %s5222_s4 = scalar_lea.hbm %s6846_s26, 32  ;;  %s5226_s7 = scalar_lea.hbm %s6890_s3, 64 }
 0x226   : > { %p5223_p9 = scmp.ne.s32.totalorder %s6846_s26, %s5222_s4  ;;  %p5227_p12 = scmp.lt.s32.totalorder %s6846_s26, %s6890_s3 }
 0x227   : > { %p5228_p13 = scmp.lt.s32.totalorder %s5226_s7, %s5222_s4 }
 0x228   : > { %p5224_p10 = pnand %p5223_p9, %p5354_p4 }
 0x229   : > { %p5229_p0 = por %p5228_p13, %p5227_p12 }
 0x22a   : > { %p5225_p11 = pneg %p5224_p10 }
 0x22c   : > { %p5230_p1 = pnand %p5229_p0, %p5225_p11 }
 0x22e   : > { %5233 = shalt.err (!%p5230_p1)
}
 0x22f   : > { %5121 = dma.vmem_to_hbm [thread:$0]  (%p5354_p4), %s3749_s18, 32, %s6846_s26, %s3717_s27  }
 0x230 PF: > { %p5131_p2 = scmp.ge.s32.totalorder %s5288_s17, 2  ;;  %s3760_s11 = sand.u32 1, %s5268_s12  }
 0x231   : > { %s3761_s21 = scalar_lea.sflag [#allocation3], %s3760_s11 }
 0x232   : > { %p5125_p3 = pnand %p5131_p2, %p5361_p8 }
 0x234   : > { %p5126_p5 = pneg %p5125_p3 }
 0x236   : > { %5259 = dma.done.wait (%p5126_p5), %s3761_s21, 4096  }
 0x237   : > { %5261 = vsyncadd (%p5126_p5), %s3761_s21, 4294963200  ;;  %s3770_s9 = scalar_lea.sflag [#allocation5], %s3760_s11 }
 0x238   : > { %5263 = dma.done.wait (%p5126_p5), %s3770_s9, 32  }
 0x239   : > { %5265 = vsyncadd (%p5126_p5), %s3770_s9, 4294967264  ;;  %s20_s17 = sadd.s32 1, %s5288_s17   ;;  %s7134_s12 = smov %s5272_s13 }
 0x23a   : > { %p17_p6 = scmp.ge.s32.totalorder %s20_s17, 4   ;;  %s7135_s13 = smov %s5276_s14 }
 0x23b   : > { %s7136_s14 = smov %s5367_s25  ;;  %s7137_s15 = smov %s5284_s16 }
 0x23c   : > { %s7138_s16 = smov %s7140_s20  ;;  %19 = sbr.rel (!%p17_p6) target bundleno = 6 (0x6), region = 93 }
 0x241   :  { %3775 = vsyncpa [#allocation3], 1 }
 0x242   :  { %3777 = vsyncpa [#allocation3 + $0x1], 1 }
 0x243   :  { %3778 = vsyncpa [#allocation5], 1 }
 0x244   :  { %3780 = vsyncpa [#allocation5 + $0x1], 1 }

</bundles_post_ra>
